<compile_context>
chip_gen: v5e
topology: v5e:2x2
jax: 0.10.0
libtpu: 0.0.40
codegen_flags: <defaults>
</compile_context>

<pallas_src>
import jax
import jax.numpy as jnp
from jax.experimental import pallas as pl
from jax.experimental.pallas import tpu as pltpu

_COL0 = 8  # sublane-tile-aligned column where valid data starts in the scratch


def _down_fused_kernel(x_ee_ref, x_eo_ref, x_oe_ref, x_oo_ref,
                       wd_ref, bd_ref, w1_ref, b1_ref, w2_ref, b2_ref,
                       y_ref, down_ref, dpad_ref, y1pad_ref):
    _, ho, wo, cin = down_ref.shape
    cout = y_ref.shape[-1]

    def conv3x3_relu(tap_fn, w_ref, b_ref, c_in, c_out):
        """Direct 3x3 conv: nine tap dots accumulated in f32, then bias+ReLU."""
        acc = jnp.zeros((ho * wo, c_out), jnp.float32)
        for kh in range(3):
            for kw in range(3):
                lhs = tap_fn(kh, kw).reshape(ho * wo, c_in)
                acc = acc + jnp.dot(lhs, w_ref[kh * 3 + kw],
                                    preferred_element_type=jnp.float32)
        return jnp.maximum(acc + b_ref[...], 0.0)

    def store_with_halo(pad_ref, flat_val, c):
        """Zero the halo scratch, then store the valid tile at a sublane-tile
        aligned column offset (aligned store; halo reads are cheap unaligned
        loads)."""
        pad_ref[...] = jnp.zeros(pad_ref.shape, pad_ref.dtype)
        pad_ref[1:ho + 1, _COL0:_COL0 + wo, :] = flat_val.reshape(ho, wo, c)

    # ---- DownConv: 3x3 stride-2 conv (+ folded BN bias) + ReLU --------------
    phases = ((x_ee_ref, x_eo_ref), (x_oe_ref, x_oo_ref))

    def down_tap(kh, kw):
        # A stride-2 tap (kh, kw) is a contiguous slice of the (kh%2, kw%2)
        # phase plane.
        return phases[kh % 2][kw % 2][0,
                                      kh // 2:kh // 2 + ho,
                                      kw // 2:kw // 2 + wo, :]

    down = conv3x3_relu(down_tap, wd_ref, bd_ref, cin, cin)
    down_ref[0] = down.reshape(ho, wo, cin)   # user-facing output (unpadded)
    store_with_halo(dpad_ref, down, cin)      # stays in VMEM for conv1

    # ---- DoubleConv conv1 (stride 1), input kept in VMEM --------------------
    def c1_tap(kh, kw):
        return dpad_ref[kh:kh + ho, _COL0 - 1 + kw:_COL0 - 1 + kw + wo, :]

    y1 = conv3x3_relu(c1_tap, w1_ref, b1_ref, cin, cout)
    store_with_halo(y1pad_ref, y1, cout)      # stays in VMEM for conv2

    # ---- DoubleConv conv2 (stride 1) ----------------------------------------
    def c2_tap(kh, kw):
        return y1pad_ref[kh:kh + ho, _COL0 - 1 + kw:_COL0 - 1 + kw + wo, :]

    y2 = conv3x3_relu(c2_tap, w2_ref, b2_ref, cout, cout)
    y_ref[0] = y2.reshape(ho, wo, cout)


def down_forward(x_nchw, params):
    """Forward of `Down`: returns (double_conv_out, down_conv_out), both NCHW."""
    x = jnp.transpose(x_nchw, (0, 2, 3, 1)).astype(jnp.float32)   # NCHW -> NHWC
    n, h, w, cin = x.shape
    cout = params["w1"].shape[-1]
    assert h % 2 == 0 and w % 2 == 0, "stride-2 DownConv expects even H, W"
    ho, wo = h // 2, w // 2
    hp, wp = ho + 1, wo + 1          # phase-plane spatial extent

    # 2x2 phase decomposition of the padded input (~1x input bytes, done once)
    # so the kernel's stride-2 taps are contiguous static slices.
    xpad = jnp.pad(x, ((0, 0), (1, 1), (1, 1), (0, 0)))
    x_ee = xpad[:, 0::2, 0::2, :]
    x_eo = xpad[:, 0::2, 1::2, :]
    x_oe = xpad[:, 1::2, 0::2, :]
    x_oo = xpad[:, 1::2, 1::2, :]

    # Per-tap weight matrices [9, Cin, Cout]; BN scale is already folded in.
    wd = params["w_down"].reshape(9, cin, cin)
    w1 = params["w1"].reshape(9, cin, cout)
    w2 = params["w2"].reshape(9, cout, cout)
    bd = params["b_down"].reshape(1, cin)
    b1 = params["b1"].reshape(1, cout)
    b2 = params["b2"].reshape(1, cout)

    x_spec = pl.BlockSpec((1, hp, wp, cin), lambda b: (b, 0, 0, 0))
    inv3 = lambda b: (0, 0, 0)       # grid-invariant (VMEM-resident) weights
    inv2 = lambda b: (0, 0)

    flops = 2 * n * ho * wo * 9 * (cin * cin + cin * cout + cout * cout)
    bytes_accessed = (4 * n * hp * wp * cin * 4                         # input phases
                      + 9 * (cin * cin + cin * cout + cout * cout) * 4  # weights
                      + (cin + 2 * cout) * 4                            # biases
                      + n * ho * wo * (cin + cout) * 4)                 # outputs

    scratch_w = _COL0 + wo + 8       # left halo tile + valid cols + right slack

    y, down = pl.pallas_call(
        _down_fused_kernel,
        out_shape=(jax.ShapeDtypeStruct((n, ho, wo, cout), jnp.float32),
                   jax.ShapeDtypeStruct((n, ho, wo, cin), jnp.float32)),
        grid_spec=pltpu.PrefetchScalarGridSpec(
            num_scalar_prefetch=0,
            grid=(n,),
            in_specs=[
                x_spec, x_spec, x_spec, x_spec,
                pl.BlockSpec((9, cin, cin), inv3),    # w_down (resident)
                pl.BlockSpec((1, cin), inv2),         # b_down
                pl.BlockSpec((9, cin, cout), inv3),   # w1
                pl.BlockSpec((1, cout), inv2),        # b1
                pl.BlockSpec((9, cout, cout), inv3),  # w2
                pl.BlockSpec((1, cout), inv2),        # b2
            ],
            out_specs=[
                pl.BlockSpec((1, ho, wo, cout), lambda b: (b, 0, 0, 0)),
                pl.BlockSpec((1, ho, wo, cin), lambda b: (b, 0, 0, 0)),
            ],
            scratch_shapes=[
                pltpu.VMEM((ho + 2, scratch_w, cin), jnp.float32),   # padded down
                pltpu.VMEM((ho + 2, scratch_w, cout), jnp.float32),  # padded conv1
            ],
        ),
        compiler_params=pltpu.CompilerParams(
            dimension_semantics=("parallel",),
            vmem_limit_bytes=32 * 1024 * 1024,
        ),
        cost_estimate=pl.CostEstimate(flops=flops, transcendentals=0,
                                      bytes_accessed=bytes_accessed),
    )(x_ee, x_eo, x_oe, x_oo, wd, bd, w1, b1, w2, b2)

    # Back to NCHW to match the PyTorch module's output convention.
    return (jnp.transpose(y, (0, 3, 1, 2)), jnp.transpose(down, (0, 3, 1, 2)))


# ----------------------------------------------------------------------------
# Parameter prep: synthetic conv weights + eval-mode BN folded into (w, bias).
# ----------------------------------------------------------------------------
def _fold_bn_into_conv(w_hwio, gamma, beta, running_mean, running_var, eps=1e-5):
    scale = gamma / jnp.sqrt(running_var + eps)
    w_folded = w_hwio * scale[None, None, None, :]
    bias = beta - running_mean * scale
    return w_folded.astype(jnp.float32), bias.astype(jnp.float32)


def make_params(in_ch, out_ch, key):
    """Deterministic synthetic parameters matching the PyTorch module shapes."""
    ks = jax.random.split(key, 6)

    def conv_w(k, cin, cout):
        # HWIO layout (same role as torch's [cout, cin, 3, 3] permuted to HWIO).
        return 0.1 * jax.random.normal(k, (3, 3, cin, cout), jnp.float32)

    def bn_stats(k, c):
        k1, k2, k3 = jax.random.split(k, 3)
        gamma = 1.0 + 0.05 * jax.random.normal(k1, (c,), jnp.float32)
        beta = 0.05 * jax.random.normal(k2, (c,), jnp.float32)
        rm = 0.05 * jax.random.normal(k3, (c,), jnp.float32)
        rv = jnp.ones((c,), jnp.float32)
        return gamma, beta, rm, rv

    w_down, b_down = _fold_bn_into_conv(conv_w(ks[0], in_ch, in_ch),
                                        *bn_stats(ks[1], in_ch))
    w1, b1 = _fold_bn_into_conv(conv_w(ks[2], in_ch, out_ch),
                                *bn_stats(ks[3], out_ch))
    w2, b2 = _fold_bn_into_conv(conv_w(ks[4], out_ch, out_ch),
                                *bn_stats(ks[5], out_ch))

    return {"w_down": w_down, "b_down": b_down,
            "w1": w1, "b1": b1, "w2": w2, "b2": b2}


# ----------------------------------------------------------------------------
# Plain-JAX reference (lax.conv, same folded params) for a correctness check.
# ----------------------------------------------------------------------------
def _reference_stage(x_nhwc, w_hwio, bias, *, stride):
    y = jax.lax.conv_general_dilated(
        x_nhwc, w_hwio,
        window_strides=(stride, stride),
        padding=((1, 1), (1, 1)),
        dimension_numbers=("NHWC", "HWIO", "NHWC"),
        precision=jax.lax.Precision.HIGHEST,
        preferred_element_type=jnp.float32)
    return jnp.maximum(y + bias, 0.0)


def reference_down_forward(x_nchw, params):
    x = jnp.transpose(x_nchw, (0, 2, 3, 1)).astype(jnp.float32)
    down = _reference_stage(x, params["w_down"], params["b_down"], stride=2)
    y = _reference_stage(down, params["w1"], params["b1"], stride=1)
    y = _reference_stage(y, params["w2"], params["b2"], stride=1)
    return (jnp.transpose(y, (0, 3, 1, 2)), jnp.transpose(down, (0, 3, 1, 2)))


if __name__ == "__main__":
    key = jax.random.PRNGKey(0)
    k_x, k_p = jax.random.split(key)

    N, in_ch, out_ch, H, W = 2, 4, 8, 16, 16
    x = jax.random.normal(k_x, (N, in_ch, H, W), jnp.float32)   # NCHW like torch
    params = make_params(in_ch, out_ch, k_p)

    y, down_x = jax.jit(down_forward)(x, params)
    jax.block_until_ready((y, down_x))

    assert y.shape == (N, out_ch, H // 2, W // 2), y.shape
    assert down_x.shape == (N, in_ch, H // 2, W // 2), down_x.shape

    # Numerical check against the lax.conv reference (same folded parameters).
    y_ref, down_ref = jax.jit(reference_down_forward)(x, params)
    jax.block_until_ready((y_ref, down_ref))
    assert jnp.allclose(down_x, down_ref, atol=1e-2, rtol=1e-2), "down mismatch"
    assert jnp.allclose(y, y_ref, atol=1e-2, rtol=1e-2), "double_conv mismatch"

    print("KERNEL_OK")
</pallas_src>

<mosaic_0001>
module attributes {stable_mosaic.version = 11 : i64} {
  func.func @_down_fused_kernel(%arg0: i32, %arg1: memref<1x9x9x4xf32, #tpu.memory_space<vmem>>, %arg2: memref<1x9x9x4xf32, #tpu.memory_space<vmem>>, %arg3: memref<1x9x9x4xf32, #tpu.memory_space<vmem>>, %arg4: memref<1x9x9x4xf32, #tpu.memory_space<vmem>>, %arg5: memref<9x4x4xf32, #tpu.memory_space<vmem>>, %arg6: memref<1x4xf32, #tpu.memory_space<vmem>>, %arg7: memref<9x4x8xf32, #tpu.memory_space<vmem>>, %arg8: memref<1x8xf32, #tpu.memory_space<vmem>>, %arg9: memref<9x8x8xf32, #tpu.memory_space<vmem>>, %arg10: memref<1x8xf32, #tpu.memory_space<vmem>>, %arg11: memref<1x8x8x8xf32, #tpu.memory_space<vmem>>, %arg12: memref<1x8x8x4xf32, #tpu.memory_space<vmem>>, %arg13: memref<10x24x4xf32, #tpu.memory_space<vmem>>, %arg14: memref<10x24x8xf32, #tpu.memory_space<vmem>>) attributes {dimension_semantics = [#tpu.dimension_semantics<parallel>], iteration_bounds = array<i64: 2>, scalar_prefetch = 0 : i64, scratch_operands = 2 : i64, tpu.core_type = #tpu.core_type<tc>, window_params = [{transform_indices = @transform_0, window_bounds = array<i64: 1, 9, 9, 4>}, {transform_indices = @transform_1, window_bounds = array<i64: 1, 9, 9, 4>}, {transform_indices = @transform_2, window_bounds = array<i64: 1, 9, 9, 4>}, {transform_indices = @transform_3, window_bounds = array<i64: 1, 9, 9, 4>}, {pipeline_mode = #tpu.pipeline_mode<synchronous>, transform_indices = @transform_4, window_bounds = array<i64: 9, 4, 4>}, {pipeline_mode = #tpu.pipeline_mode<synchronous>, transform_indices = @transform_5, window_bounds = array<i64: 1, 4>}, {pipeline_mode = #tpu.pipeline_mode<synchronous>, transform_indices = @transform_6, window_bounds = array<i64: 9, 4, 8>}, {pipeline_mode = #tpu.pipeline_mode<synchronous>, transform_indices = @transform_7, window_bounds = array<i64: 1, 8>}, {pipeline_mode = #tpu.pipeline_mode<synchronous>, transform_indices = @transform_8, window_bounds = array<i64: 9, 8, 8>}, {pipeline_mode = #tpu.pipeline_mode<synchronous>, transform_indices = @transform_9, window_bounds = array<i64: 1, 8>}, {transform_indices = @transform_10, window_bounds = array<i64: 1, 8, 8, 8>}, {transform_indices = @transform_11, window_bounds = array<i64: 1, 8, 8, 4>}]} {
    %cst = arith.constant 0.000000e+00 : f32
    %0 = vector.broadcast %cst : f32 to vector<64x4xf32>
    %c0 = arith.constant 0 : index
    %c0_0 = arith.constant 0 : index
    %c0_1 = arith.constant 0 : index
    %c0_2 = arith.constant 0 : index
    %1 = vector.load %arg1[%c0, %c0_0, %c0_1, %c0_2] : memref<1x9x9x4xf32, #tpu.memory_space<vmem>>, vector<1x8x8x4xf32>
    %2 = vector.shape_cast %1 : vector<1x8x8x4xf32> to vector<8x8x4xf32>
    %3 = vector.shape_cast %2 : vector<8x8x4xf32> to vector<64x4xf32>
    %c0_3 = arith.constant 0 : index
    %c0_4 = arith.constant 0 : index
    %c0_5 = arith.constant 0 : index
    %4 = vector.load %arg5[%c0_3, %c0_4, %c0_5] : memref<9x4x4xf32, #tpu.memory_space<vmem>>, vector<1x4x4xf32>
    %5 = vector.shape_cast %4 : vector<1x4x4xf32> to vector<4x4xf32>
    %cst_6 = arith.constant dense<0.000000e+00> : vector<64x4xf32>
    %6 = tpu.matmul %3, %5, %cst_6 {dimension_numbers = #tpu.dot_dimension_numbers<[1], [0], [0], [1], [0, 0, 1, 1], [], []>} : vector<64x4xf32>, vector<4x4xf32>, vector<64x4xf32> -> vector<64x4xf32>
    %7 = arith.addf %0, %6 : vector<64x4xf32>
    %c0_7 = arith.constant 0 : index
    %c0_8 = arith.constant 0 : index
    %c0_9 = arith.constant 0 : index
    %c0_10 = arith.constant 0 : index
    %8 = vector.load %arg2[%c0_7, %c0_8, %c0_9, %c0_10] : memref<1x9x9x4xf32, #tpu.memory_space<vmem>>, vector<1x8x8x4xf32>
    %9 = vector.shape_cast %8 : vector<1x8x8x4xf32> to vector<8x8x4xf32>
    %10 = vector.shape_cast %9 : vector<8x8x4xf32> to vector<64x4xf32>
    %c1 = arith.constant 1 : index
    %c0_11 = arith.constant 0 : index
    %c0_12 = arith.constant 0 : index
    %11 = vector.load %arg5[%c1, %c0_11, %c0_12] : memref<9x4x4xf32, #tpu.memory_space<vmem>>, vector<1x4x4xf32>
    %12 = vector.shape_cast %11 : vector<1x4x4xf32> to vector<4x4xf32>
    %cst_13 = arith.constant dense<0.000000e+00> : vector<64x4xf32>
    %13 = tpu.matmul %10, %12, %cst_13 {dimension_numbers = #tpu.dot_dimension_numbers<[1], [0], [0], [1], [0, 0, 1, 1], [], []>} : vector<64x4xf32>, vector<4x4xf32>, vector<64x4xf32> -> vector<64x4xf32>
    %14 = arith.addf %7, %13 : vector<64x4xf32>
    %c0_14 = arith.constant 0 : index
    %c0_15 = arith.constant 0 : index
    %c1_16 = arith.constant 1 : index
    %c0_17 = arith.constant 0 : index
    %15 = vector.load %arg1[%c0_14, %c0_15, %c1_16, %c0_17] : memref<1x9x9x4xf32, #tpu.memory_space<vmem>>, vector<1x8x8x4xf32>
    %16 = vector.shape_cast %15 : vector<1x8x8x4xf32> to vector<8x8x4xf32>
    %17 = vector.shape_cast %16 : vector<8x8x4xf32> to vector<64x4xf32>
    %c2 = arith.constant 2 : index
    %c0_18 = arith.constant 0 : index
    %c0_19 = arith.constant 0 : index
    %18 = vector.load %arg5[%c2, %c0_18, %c0_19] : memref<9x4x4xf32, #tpu.memory_space<vmem>>, vector<1x4x4xf32>
    %19 = vector.shape_cast %18 : vector<1x4x4xf32> to vector<4x4xf32>
    %cst_20 = arith.constant dense<0.000000e+00> : vector<64x4xf32>
    %20 = tpu.matmul %17, %19, %cst_20 {dimension_numbers = #tpu.dot_dimension_numbers<[1], [0], [0], [1], [0, 0, 1, 1], [], []>} : vector<64x4xf32>, vector<4x4xf32>, vector<64x4xf32> -> vector<64x4xf32>
    %21 = arith.addf %14, %20 : vector<64x4xf32>
    %c0_21 = arith.constant 0 : index
    %c0_22 = arith.constant 0 : index
    %c0_23 = arith.constant 0 : index
    %c0_24 = arith.constant 0 : index
    %22 = vector.load %arg3[%c0_21, %c0_22, %c0_23, %c0_24] : memref<1x9x9x4xf32, #tpu.memory_space<vmem>>, vector<1x8x8x4xf32>
    %23 = vector.shape_cast %22 : vector<1x8x8x4xf32> to vector<8x8x4xf32>
    %24 = vector.shape_cast %23 : vector<8x8x4xf32> to vector<64x4xf32>
    %c3 = arith.constant 3 : index
    %c0_25 = arith.constant 0 : index
    %c0_26 = arith.constant 0 : index
    %25 = vector.load %arg5[%c3, %c0_25, %c0_26] : memref<9x4x4xf32, #tpu.memory_space<vmem>>, vector<1x4x4xf32>
    %26 = vector.shape_cast %25 : vector<1x4x4xf32> to vector<4x4xf32>
    %cst_27 = arith.constant dense<0.000000e+00> : vector<64x4xf32>
    %27 = tpu.matmul %24, %26, %cst_27 {dimension_numbers = #tpu.dot_dimension_numbers<[1], [0], [0], [1], [0, 0, 1, 1], [], []>} : vector<64x4xf32>, vector<4x4xf32>, vector<64x4xf32> -> vector<64x4xf32>
    %28 = arith.addf %21, %27 : vector<64x4xf32>
    %c0_28 = arith.constant 0 : index
    %c0_29 = arith.constant 0 : index
    %c0_30 = arith.constant 0 : index
    %c0_31 = arith.constant 0 : index
    %29 = vector.load %arg4[%c0_28, %c0_29, %c0_30, %c0_31] : memref<1x9x9x4xf32, #tpu.memory_space<vmem>>, vector<1x8x8x4xf32>
    %30 = vector.shape_cast %29 : vector<1x8x8x4xf32> to vector<8x8x4xf32>
    %31 = vector.shape_cast %30 : vector<8x8x4xf32> to vector<64x4xf32>
    %c4 = arith.constant 4 : index
    %c0_32 = arith.constant 0 : index
    %c0_33 = arith.constant 0 : index
    %32 = vector.load %arg5[%c4, %c0_32, %c0_33] : memref<9x4x4xf32, #tpu.memory_space<vmem>>, vector<1x4x4xf32>
    %33 = vector.shape_cast %32 : vector<1x4x4xf32> to vector<4x4xf32>
    %cst_34 = arith.constant dense<0.000000e+00> : vector<64x4xf32>
    %34 = tpu.matmul %31, %33, %cst_34 {dimension_numbers = #tpu.dot_dimension_numbers<[1], [0], [0], [1], [0, 0, 1, 1], [], []>} : vector<64x4xf32>, vector<4x4xf32>, vector<64x4xf32> -> vector<64x4xf32>
    %35 = arith.addf %28, %34 : vector<64x4xf32>
    %c0_35 = arith.constant 0 : index
    %c0_36 = arith.constant 0 : index
    %c1_37 = arith.constant 1 : index
    %c0_38 = arith.constant 0 : index
    %36 = vector.load %arg3[%c0_35, %c0_36, %c1_37, %c0_38] : memref<1x9x9x4xf32, #tpu.memory_space<vmem>>, vector<1x8x8x4xf32>
    %37 = vector.shape_cast %36 : vector<1x8x8x4xf32> to vector<8x8x4xf32>
    %38 = vector.shape_cast %37 : vector<8x8x4xf32> to vector<64x4xf32>
    %c5 = arith.constant 5 : index
    %c0_39 = arith.constant 0 : index
    %c0_40 = arith.constant 0 : index
    %39 = vector.load %arg5[%c5, %c0_39, %c0_40] : memref<9x4x4xf32, #tpu.memory_space<vmem>>, vector<1x4x4xf32>
    %40 = vector.shape_cast %39 : vector<1x4x4xf32> to vector<4x4xf32>
    %cst_41 = arith.constant dense<0.000000e+00> : vector<64x4xf32>
    %41 = tpu.matmul %38, %40, %cst_41 {dimension_numbers = #tpu.dot_dimension_numbers<[1], [0], [0], [1], [0, 0, 1, 1], [], []>} : vector<64x4xf32>, vector<4x4xf32>, vector<64x4xf32> -> vector<64x4xf32>
    %42 = arith.addf %35, %41 : vector<64x4xf32>
    %c0_42 = arith.constant 0 : index
    %c1_43 = arith.constant 1 : index
    %c0_44 = arith.constant 0 : index
    %c0_45 = arith.constant 0 : index
    %43 = vector.load %arg1[%c0_42, %c1_43, %c0_44, %c0_45] : memref<1x9x9x4xf32, #tpu.memory_space<vmem>>, vector<1x8x8x4xf32>
    %44 = vector.shape_cast %43 : vector<1x8x8x4xf32> to vector<8x8x4xf32>
    %45 = vector.shape_cast %44 : vector<8x8x4xf32> to vector<64x4xf32>
    %c6 = arith.constant 6 : index
    %c0_46 = arith.constant 0 : index
    %c0_47 = arith.constant 0 : index
    %46 = vector.load %arg5[%c6, %c0_46, %c0_47] : memref<9x4x4xf32, #tpu.memory_space<vmem>>, vector<1x4x4xf32>
    %47 = vector.shape_cast %46 : vector<1x4x4xf32> to vector<4x4xf32>
    %cst_48 = arith.constant dense<0.000000e+00> : vector<64x4xf32>
    %48 = tpu.matmul %45, %47, %cst_48 {dimension_numbers = #tpu.dot_dimension_numbers<[1], [0], [0], [1], [0, 0, 1, 1], [], []>} : vector<64x4xf32>, vector<4x4xf32>, vector<64x4xf32> -> vector<64x4xf32>
    %49 = arith.addf %42, %48 : vector<64x4xf32>
    %c0_49 = arith.constant 0 : index
    %c1_50 = arith.constant 1 : index
    %c0_51 = arith.constant 0 : index
    %c0_52 = arith.constant 0 : index
    %50 = vector.load %arg2[%c0_49, %c1_50, %c0_51, %c0_52] : memref<1x9x9x4xf32, #tpu.memory_space<vmem>>, vector<1x8x8x4xf32>
    %51 = vector.shape_cast %50 : vector<1x8x8x4xf32> to vector<8x8x4xf32>
    %52 = vector.shape_cast %51 : vector<8x8x4xf32> to vector<64x4xf32>
    %c7 = arith.constant 7 : index
    %c0_53 = arith.constant 0 : index
    %c0_54 = arith.constant 0 : index
    %53 = vector.load %arg5[%c7, %c0_53, %c0_54] : memref<9x4x4xf32, #tpu.memory_space<vmem>>, vector<1x4x4xf32>
    %54 = vector.shape_cast %53 : vector<1x4x4xf32> to vector<4x4xf32>
    %cst_55 = arith.constant dense<0.000000e+00> : vector<64x4xf32>
    %55 = tpu.matmul %52, %54, %cst_55 {dimension_numbers = #tpu.dot_dimension_numbers<[1], [0], [0], [1], [0, 0, 1, 1], [], []>} : vector<64x4xf32>, vector<4x4xf32>, vector<64x4xf32> -> vector<64x4xf32>
    %56 = arith.addf %49, %55 : vector<64x4xf32>
    %c0_56 = arith.constant 0 : index
    %c1_57 = arith.constant 1 : index
    %c1_58 = arith.constant 1 : index
    %c0_59 = arith.constant 0 : index
    %57 = vector.load %arg1[%c0_56, %c1_57, %c1_58, %c0_59] : memref<1x9x9x4xf32, #tpu.memory_space<vmem>>, vector<1x8x8x4xf32>
    %58 = vector.shape_cast %57 : vector<1x8x8x4xf32> to vector<8x8x4xf32>
    %59 = vector.shape_cast %58 : vector<8x8x4xf32> to vector<64x4xf32>
    %c8 = arith.constant 8 : index
    %c0_60 = arith.constant 0 : index
    %c0_61 = arith.constant 0 : index
    %60 = vector.load %arg5[%c8, %c0_60, %c0_61] : memref<9x4x4xf32, #tpu.memory_space<vmem>>, vector<1x4x4xf32>
    %61 = vector.shape_cast %60 : vector<1x4x4xf32> to vector<4x4xf32>
    %cst_62 = arith.constant dense<0.000000e+00> : vector<64x4xf32>
    %62 = tpu.matmul %59, %61, %cst_62 {dimension_numbers = #tpu.dot_dimension_numbers<[1], [0], [0], [1], [0, 0, 1, 1], [], []>} : vector<64x4xf32>, vector<4x4xf32>, vector<64x4xf32> -> vector<64x4xf32>
    %63 = arith.addf %56, %62 : vector<64x4xf32>
    %c0_63 = arith.constant 0 : index
    %c0_64 = arith.constant 0 : index
    %64 = vector.load %arg6[%c0_63, %c0_64] : memref<1x4xf32, #tpu.memory_space<vmem>>, vector<1x4xf32>
    %65 = vector.broadcast %64 : vector<1x4xf32> to vector<64x4xf32>
    %66 = arith.addf %63, %65 : vector<64x4xf32>
    %cst_65 = arith.constant 0.000000e+00 : f32
    %67 = vector.broadcast %cst_65 : f32 to vector<64x4xf32>
    %68 = arith.maximumf %66, %67 : vector<64x4xf32>
    %69 = vector.shape_cast %68 : vector<64x4xf32> to vector<8x8x4xf32>
    %c0_66 = arith.constant 0 : index
    %c0_67 = arith.constant 0 : index
    %c0_68 = arith.constant 0 : index
    %c0_69 = arith.constant 0 : index
    %70 = vector.load %arg12[%c0_66, %c0_67, %c0_68, %c0_69] : memref<1x8x8x4xf32, #tpu.memory_space<vmem>>, vector<1x8x8x4xf32>
    %71 = vector.shape_cast %70 : vector<1x8x8x4xf32> to vector<8x8x4xf32>
    %72 = vector.shape_cast %69 : vector<8x8x4xf32> to vector<1x8x8x4xf32>
    tpu.vector_store %arg12[%c0_66, %c0_67, %c0_68, %c0_69], %72 {strides = array<i32>} : memref<1x8x8x4xf32, #tpu.memory_space<vmem>>, vector<1x8x8x4xf32>,
    %cst_70 = arith.constant 0.000000e+00 : f32
    %73 = vector.broadcast %cst_70 : f32 to vector<10x24x4xf32>
    %c0_71 = arith.constant 0 : index
    %c0_72 = arith.constant 0 : index
    %c0_73 = arith.constant 0 : index
    %74 = vector.load %arg13[%c0_71, %c0_72, %c0_73] : memref<10x24x4xf32, #tpu.memory_space<vmem>>, vector<10x24x4xf32>
    tpu.vector_store %arg13[%c0_71, %c0_72, %c0_73], %73 {strides = array<i32>} : memref<10x24x4xf32, #tpu.memory_space<vmem>>, vector<10x24x4xf32>,
    %75 = vector.shape_cast %68 : vector<64x4xf32> to vector<8x8x4xf32>
    %c1_74 = arith.constant 1 : index
    %c8_75 = arith.constant 8 : index
    %c0_76 = arith.constant 0 : index
    %76 = vector.load %arg13[%c1_74, %c8_75, %c0_76] : memref<10x24x4xf32, #tpu.memory_space<vmem>>, vector<8x8x4xf32>
    tpu.vector_store %arg13[%c1_74, %c8_75, %c0_76], %75 {strides = array<i32>} : memref<10x24x4xf32, #tpu.memory_space<vmem>>, vector<8x8x4xf32>,
    %cst_77 = arith.constant 0.000000e+00 : f32
    %77 = vector.broadcast %cst_77 : f32 to vector<64x8xf32>
    %c0_78 = arith.constant 0 : index
    %c7_79 = arith.constant 7 : index
    %c0_80 = arith.constant 0 : index
    %78 = vector.load %arg13[%c0_78, %c7_79, %c0_80] : memref<10x24x4xf32, #tpu.memory_space<vmem>>, vector<8x8x4xf32>
    %79 = vector.shape_cast %78 : vector<8x8x4xf32> to vector<64x4xf32>
    %c0_81 = arith.constant 0 : index
    %c0_82 = arith.constant 0 : index
    %c0_83 = arith.constant 0 : index
    %80 = vector.load %arg7[%c0_81, %c0_82, %c0_83] : memref<9x4x8xf32, #tpu.memory_space<vmem>>, vector<1x4x8xf32>
    %81 = vector.shape_cast %80 : vector<1x4x8xf32> to vector<4x8xf32>
    %cst_84 = arith.constant dense<0.000000e+00> : vector<64x8xf32>
    %82 = tpu.matmul %79, %81, %cst_84 {dimension_numbers = #tpu.dot_dimension_numbers<[1], [0], [0], [1], [0, 0, 1, 1], [], []>} : vector<64x4xf32>, vector<4x8xf32>, vector<64x8xf32> -> vector<64x8xf32>
    %83 = arith.addf %77, %82 : vector<64x8xf32>
    %c0_85 = arith.constant 0 : index
    %c8_86 = arith.constant 8 : index
    %c0_87 = arith.constant 0 : index
    %84 = vector.load %arg13[%c0_85, %c8_86, %c0_87] : memref<10x24x4xf32, #tpu.memory_space<vmem>>, vector<8x8x4xf32>
    %85 = vector.shape_cast %84 : vector<8x8x4xf32> to vector<64x4xf32>
    %c1_88 = arith.constant 1 : index
    %c0_89 = arith.constant 0 : index
    %c0_90 = arith.constant 0 : index
    %86 = vector.load %arg7[%c1_88, %c0_89, %c0_90] : memref<9x4x8xf32, #tpu.memory_space<vmem>>, vector<1x4x8xf32>
    %87 = vector.shape_cast %86 : vector<1x4x8xf32> to vector<4x8xf32>
    %cst_91 = arith.constant dense<0.000000e+00> : vector<64x8xf32>
    %88 = tpu.matmul %85, %87, %cst_91 {dimension_numbers = #tpu.dot_dimension_numbers<[1], [0], [0], [1], [0, 0, 1, 1], [], []>} : vector<64x4xf32>, vector<4x8xf32>, vector<64x8xf32> -> vector<64x8xf32>
    %89 = arith.addf %83, %88 : vector<64x8xf32>
    %c0_92 = arith.constant 0 : index
    %c9 = arith.constant 9 : index
    %c0_93 = arith.constant 0 : index
    %90 = vector.load %arg13[%c0_92, %c9, %c0_93] : memref<10x24x4xf32, #tpu.memory_space<vmem>>, vector<8x8x4xf32>
    %91 = vector.shape_cast %90 : vector<8x8x4xf32> to vector<64x4xf32>
    %c2_94 = arith.constant 2 : index
    %c0_95 = arith.constant 0 : index
    %c0_96 = arith.constant 0 : index
    %92 = vector.load %arg7[%c2_94, %c0_95, %c0_96] : memref<9x4x8xf32, #tpu.memory_space<vmem>>, vector<1x4x8xf32>
    %93 = vector.shape_cast %92 : vector<1x4x8xf32> to vector<4x8xf32>
    %cst_97 = arith.constant dense<0.000000e+00> : vector<64x8xf32>
    %94 = tpu.matmul %91, %93, %cst_97 {dimension_numbers = #tpu.dot_dimension_numbers<[1], [0], [0], [1], [0, 0, 1, 1], [], []>} : vector<64x4xf32>, vector<4x8xf32>, vector<64x8xf32> -> vector<64x8xf32>
    %95 = arith.addf %89, %94 : vector<64x8xf32>
    %c1_98 = arith.constant 1 : index
    %c7_99 = arith.constant 7 : index
    %c0_100 = arith.constant 0 : index
    %96 = vector.load %arg13[%c1_98, %c7_99, %c0_100] : memref<10x24x4xf32, #tpu.memory_space<vmem>>, vector<8x8x4xf32>
    %97 = vector.shape_cast %96 : vector<8x8x4xf32> to vector<64x4xf32>
    %c3_101 = arith.constant 3 : index
    %c0_102 = arith.constant 0 : index
    %c0_103 = arith.constant 0 : index
    %98 = vector.load %arg7[%c3_101, %c0_102, %c0_103] : memref<9x4x8xf32, #tpu.memory_space<vmem>>, vector<1x4x8xf32>
    %99 = vector.shape_cast %98 : vector<1x4x8xf32> to vector<4x8xf32>
    %cst_104 = arith.constant dense<0.000000e+00> : vector<64x8xf32>
    %100 = tpu.matmul %97, %99, %cst_104 {dimension_numbers = #tpu.dot_dimension_numbers<[1], [0], [0], [1], [0, 0, 1, 1], [], []>} : vector<64x4xf32>, vector<4x8xf32>, vector<64x8xf32> -> vector<64x8xf32>
    %101 = arith.addf %95, %100 : vector<64x8xf32>
    %c1_105 = arith.constant 1 : index
    %c8_106 = arith.constant 8 : index
    %c0_107 = arith.constant 0 : index
    %102 = vector.load %arg13[%c1_105, %c8_106, %c0_107] : memref<10x24x4xf32, #tpu.memory_space<vmem>>, vector<8x8x4xf32>
    %103 = vector.shape_cast %102 : vector<8x8x4xf32> to vector<64x4xf32>
    %c4_108 = arith.constant 4 : index
    %c0_109 = arith.constant 0 : index
    %c0_110 = arith.constant 0 : index
    %104 = vector.load %arg7[%c4_108, %c0_109, %c0_110] : memref<9x4x8xf32, #tpu.memory_space<vmem>>, vector<1x4x8xf32>
    %105 = vector.shape_cast %104 : vector<1x4x8xf32> to vector<4x8xf32>
    %cst_111 = arith.constant dense<0.000000e+00> : vector<64x8xf32>
    %106 = tpu.matmul %103, %105, %cst_111 {dimension_numbers = #tpu.dot_dimension_numbers<[1], [0], [0], [1], [0, 0, 1, 1], [], []>} : vector<64x4xf32>, vector<4x8xf32>, vector<64x8xf32> -> vector<64x8xf32>
    %107 = arith.addf %101, %106 : vector<64x8xf32>
    %c1_112 = arith.constant 1 : index
    %c9_113 = arith.constant 9 : index
    %c0_114 = arith.constant 0 : index
    %108 = vector.load %arg13[%c1_112, %c9_113, %c0_114] : memref<10x24x4xf32, #tpu.memory_space<vmem>>, vector<8x8x4xf32>
    %109 = vector.shape_cast %108 : vector<8x8x4xf32> to vector<64x4xf32>
    %c5_115 = arith.constant 5 : index
    %c0_116 = arith.constant 0 : index
    %c0_117 = arith.constant 0 : index
    %110 = vector.load %arg7[%c5_115, %c0_116, %c0_117] : memref<9x4x8xf32, #tpu.memory_space<vmem>>, vector<1x4x8xf32>
    %111 = vector.shape_cast %110 : vector<1x4x8xf32> to vector<4x8xf32>
    %cst_118 = arith.constant dense<0.000000e+00> : vector<64x8xf32>
    %112 = tpu.matmul %109, %111, %cst_118 {dimension_numbers = #tpu.dot_dimension_numbers<[1], [0], [0], [1], [0, 0, 1, 1], [], []>} : vector<64x4xf32>, vector<4x8xf32>, vector<64x8xf32> -> vector<64x8xf32>
    %113 = arith.addf %107, %112 : vector<64x8xf32>
    %c2_119 = arith.constant 2 : index
    %c7_120 = arith.constant 7 : index
    %c0_121 = arith.constant 0 : index
    %114 = vector.load %arg13[%c2_119, %c7_120, %c0_121] : memref<10x24x4xf32, #tpu.memory_space<vmem>>, vector<8x8x4xf32>
    %115 = vector.shape_cast %114 : vector<8x8x4xf32> to vector<64x4xf32>
    %c6_122 = arith.constant 6 : index
    %c0_123 = arith.constant 0 : index
    %c0_124 = arith.constant 0 : index
    %116 = vector.load %arg7[%c6_122, %c0_123, %c0_124] : memref<9x4x8xf32, #tpu.memory_space<vmem>>, vector<1x4x8xf32>
    %117 = vector.shape_cast %116 : vector<1x4x8xf32> to vector<4x8xf32>
    %cst_125 = arith.constant dense<0.000000e+00> : vector<64x8xf32>
    %118 = tpu.matmul %115, %117, %cst_125 {dimension_numbers = #tpu.dot_dimension_numbers<[1], [0], [0], [1], [0, 0, 1, 1], [], []>} : vector<64x4xf32>, vector<4x8xf32>, vector<64x8xf32> -> vector<64x8xf32>
    %119 = arith.addf %113, %118 : vector<64x8xf32>
    %c2_126 = arith.constant 2 : index
    %c8_127 = arith.constant 8 : index
    %c0_128 = arith.constant 0 : index
    %120 = vector.load %arg13[%c2_126, %c8_127, %c0_128] : memref<10x24x4xf32, #tpu.memory_space<vmem>>, vector<8x8x4xf32>
    %121 = vector.shape_cast %120 : vector<8x8x4xf32> to vector<64x4xf32>
    %c7_129 = arith.constant 7 : index
    %c0_130 = arith.constant 0 : index
    %c0_131 = arith.constant 0 : index
    %122 = vector.load %arg7[%c7_129, %c0_130, %c0_131] : memref<9x4x8xf32, #tpu.memory_space<vmem>>, vector<1x4x8xf32>
    %123 = vector.shape_cast %122 : vector<1x4x8xf32> to vector<4x8xf32>
    %cst_132 = arith.constant dense<0.000000e+00> : vector<64x8xf32>
    %124 = tpu.matmul %121, %123, %cst_132 {dimension_numbers = #tpu.dot_dimension_numbers<[1], [0], [0], [1], [0, 0, 1, 1], [], []>} : vector<64x4xf32>, vector<4x8xf32>, vector<64x8xf32> -> vector<64x8xf32>
    %125 = arith.addf %119, %124 : vector<64x8xf32>
    %c2_133 = arith.constant 2 : index
    %c9_134 = arith.constant 9 : index
    %c0_135 = arith.constant 0 : index
    %126 = vector.load %arg13[%c2_133, %c9_134, %c0_135] : memref<10x24x4xf32, #tpu.memory_space<vmem>>, vector<8x8x4xf32>
    %127 = vector.shape_cast %126 : vector<8x8x4xf32> to vector<64x4xf32>
    %c8_136 = arith.constant 8 : index
    %c0_137 = arith.constant 0 : index
    %c0_138 = arith.constant 0 : index
    %128 = vector.load %arg7[%c8_136, %c0_137, %c0_138] : memref<9x4x8xf32, #tpu.memory_space<vmem>>, vector<1x4x8xf32>
    %129 = vector.shape_cast %128 : vector<1x4x8xf32> to vector<4x8xf32>
    %cst_139 = arith.constant dense<0.000000e+00> : vector<64x8xf32>
    %130 = tpu.matmul %127, %129, %cst_139 {dimension_numbers = #tpu.dot_dimension_numbers<[1], [0], [0], [1], [0, 0, 1, 1], [], []>} : vector<64x4xf32>, vector<4x8xf32>, vector<64x8xf32> -> vector<64x8xf32>
    %131 = arith.addf %125, %130 : vector<64x8xf32>
    %c0_140 = arith.constant 0 : index
    %c0_141 = arith.constant 0 : index
    %132 = vector.load %arg8[%c0_140, %c0_141] : memref<1x8xf32, #tpu.memory_space<vmem>>, vector<1x8xf32>
    %133 = vector.broadcast %132 : vector<1x8xf32> to vector<64x8xf32>
    %134 = arith.addf %131, %133 : vector<64x8xf32>
    %cst_142 = arith.constant 0.000000e+00 : f32
    %135 = vector.broadcast %cst_142 : f32 to vector<64x8xf32>
    %136 = arith.maximumf %134, %135 : vector<64x8xf32>
    %cst_143 = arith.constant 0.000000e+00 : f32
    %137 = vector.broadcast %cst_143 : f32 to vector<10x24x8xf32>
    %c0_144 = arith.constant 0 : index
    %c0_145 = arith.constant 0 : index
    %c0_146 = arith.constant 0 : index
    %138 = vector.load %arg14[%c0_144, %c0_145, %c0_146] : memref<10x24x8xf32, #tpu.memory_space<vmem>>, vector<10x24x8xf32>
    tpu.vector_store %arg14[%c0_144, %c0_145, %c0_146], %137 {strides = array<i32>} : memref<10x24x8xf32, #tpu.memory_space<vmem>>, vector<10x24x8xf32>,
    %139 = vector.shape_cast %136 : vector<64x8xf32> to vector<8x8x8xf32>
    %c1_147 = arith.constant 1 : index
    %c8_148 = arith.constant 8 : index
    %c0_149 = arith.constant 0 : index
    %140 = vector.load %arg14[%c1_147, %c8_148, %c0_149] : memref<10x24x8xf32, #tpu.memory_space<vmem>>, vector<8x8x8xf32>
    tpu.vector_store %arg14[%c1_147, %c8_148, %c0_149], %139 {strides = array<i32>} : memref<10x24x8xf32, #tpu.memory_space<vmem>>, vector<8x8x8xf32>,
    %cst_150 = arith.constant 0.000000e+00 : f32
    %141 = vector.broadcast %cst_150 : f32 to vector<64x8xf32>
    %c0_151 = arith.constant 0 : index
    %c7_152 = arith.constant 7 : index
    %c0_153 = arith.constant 0 : index
    %142 = vector.load %arg14[%c0_151, %c7_152, %c0_153] : memref<10x24x8xf32, #tpu.memory_space<vmem>>, vector<8x8x8xf32>
    %143 = vector.shape_cast %142 : vector<8x8x8xf32> to vector<64x8xf32>
    %c0_154 = arith.constant 0 : index
    %c0_155 = arith.constant 0 : index
    %c0_156 = arith.constant 0 : index
    %144 = vector.load %arg9[%c0_154, %c0_155, %c0_156] : memref<9x8x8xf32, #tpu.memory_space<vmem>>, vector<1x8x8xf32>
    %145 = vector.shape_cast %144 : vector<1x8x8xf32> to vector<8x8xf32>
    %cst_157 = arith.constant dense<0.000000e+00> : vector<64x8xf32>
    %146 = tpu.matmul %143, %145, %cst_157 {dimension_numbers = #tpu.dot_dimension_numbers<[1], [0], [0], [1], [0, 0, 1, 1], [], []>} : vector<64x8xf32>, vector<8x8xf32>, vector<64x8xf32> -> vector<64x8xf32>
    %147 = arith.addf %141, %146 : vector<64x8xf32>
    %c0_158 = arith.constant 0 : index
    %c8_159 = arith.constant 8 : index
    %c0_160 = arith.constant 0 : index
    %148 = vector.load %arg14[%c0_158, %c8_159, %c0_160] : memref<10x24x8xf32, #tpu.memory_space<vmem>>, vector<8x8x8xf32>
    %149 = vector.shape_cast %148 : vector<8x8x8xf32> to vector<64x8xf32>
    %c1_161 = arith.constant 1 : index
    %c0_162 = arith.constant 0 : index
    %c0_163 = arith.constant 0 : index
    %150 = vector.load %arg9[%c1_161, %c0_162, %c0_163] : memref<9x8x8xf32, #tpu.memory_space<vmem>>, vector<1x8x8xf32>
    %151 = vector.shape_cast %150 : vector<1x8x8xf32> to vector<8x8xf32>
    %cst_164 = arith.constant dense<0.000000e+00> : vector<64x8xf32>
    %152 = tpu.matmul %149, %151, %cst_164 {dimension_numbers = #tpu.dot_dimension_numbers<[1], [0], [0], [1], [0, 0, 1, 1], [], []>} : vector<64x8xf32>, vector<8x8xf32>, vector<64x8xf32> -> vector<64x8xf32>
    %153 = arith.addf %147, %152 : vector<64x8xf32>
    %c0_165 = arith.constant 0 : index
    %c9_166 = arith.constant 9 : index
    %c0_167 = arith.constant 0 : index
    %154 = vector.load %arg14[%c0_165, %c9_166, %c0_167] : memref<10x24x8xf32, #tpu.memory_space<vmem>>, vector<8x8x8xf32>
    %155 = vector.shape_cast %154 : vector<8x8x8xf32> to vector<64x8xf32>
    %c2_168 = arith.constant 2 : index
    %c0_169 = arith.constant 0 : index
    %c0_170 = arith.constant 0 : index
    %156 = vector.load %arg9[%c2_168, %c0_169, %c0_170] : memref<9x8x8xf32, #tpu.memory_space<vmem>>, vector<1x8x8xf32>
    %157 = vector.shape_cast %156 : vector<1x8x8xf32> to vector<8x8xf32>
    %cst_171 = arith.constant dense<0.000000e+00> : vector<64x8xf32>
    %158 = tpu.matmul %155, %157, %cst_171 {dimension_numbers = #tpu.dot_dimension_numbers<[1], [0], [0], [1], [0, 0, 1, 1], [], []>} : vector<64x8xf32>, vector<8x8xf32>, vector<64x8xf32> -> vector<64x8xf32>
    %159 = arith.addf %153, %158 : vector<64x8xf32>
    %c1_172 = arith.constant 1 : index
    %c7_173 = arith.constant 7 : index
    %c0_174 = arith.constant 0 : index
    %160 = vector.load %arg14[%c1_172, %c7_173, %c0_174] : memref<10x24x8xf32, #tpu.memory_space<vmem>>, vector<8x8x8xf32>
    %161 = vector.shape_cast %160 : vector<8x8x8xf32> to vector<64x8xf32>
    %c3_175 = arith.constant 3 : index
    %c0_176 = arith.constant 0 : index
    %c0_177 = arith.constant 0 : index
    %162 = vector.load %arg9[%c3_175, %c0_176, %c0_177] : memref<9x8x8xf32, #tpu.memory_space<vmem>>, vector<1x8x8xf32>
    %163 = vector.shape_cast %162 : vector<1x8x8xf32> to vector<8x8xf32>
    %cst_178 = arith.constant dense<0.000000e+00> : vector<64x8xf32>
    %164 = tpu.matmul %161, %163, %cst_178 {dimension_numbers = #tpu.dot_dimension_numbers<[1], [0], [0], [1], [0, 0, 1, 1], [], []>} : vector<64x8xf32>, vector<8x8xf32>, vector<64x8xf32> -> vector<64x8xf32>
    %165 = arith.addf %159, %164 : vector<64x8xf32>
    %c1_179 = arith.constant 1 : index
    %c8_180 = arith.constant 8 : index
    %c0_181 = arith.constant 0 : index
    %166 = vector.load %arg14[%c1_179, %c8_180, %c0_181] : memref<10x24x8xf32, #tpu.memory_space<vmem>>, vector<8x8x8xf32>
    %167 = vector.shape_cast %166 : vector<8x8x8xf32> to vector<64x8xf32>
    %c4_182 = arith.constant 4 : index
    %c0_183 = arith.constant 0 : index
    %c0_184 = arith.constant 0 : index
    %168 = vector.load %arg9[%c4_182, %c0_183, %c0_184] : memref<9x8x8xf32, #tpu.memory_space<vmem>>, vector<1x8x8xf32>
    %169 = vector.shape_cast %168 : vector<1x8x8xf32> to vector<8x8xf32>
    %cst_185 = arith.constant dense<0.000000e+00> : vector<64x8xf32>
    %170 = tpu.matmul %167, %169, %cst_185 {dimension_numbers = #tpu.dot_dimension_numbers<[1], [0], [0], [1], [0, 0, 1, 1], [], []>} : vector<64x8xf32>, vector<8x8xf32>, vector<64x8xf32> -> vector<64x8xf32>
    %171 = arith.addf %165, %170 : vector<64x8xf32>
    %c1_186 = arith.constant 1 : index
    %c9_187 = arith.constant 9 : index
    %c0_188 = arith.constant 0 : index
    %172 = vector.load %arg14[%c1_186, %c9_187, %c0_188] : memref<10x24x8xf32, #tpu.memory_space<vmem>>, vector<8x8x8xf32>
    %173 = vector.shape_cast %172 : vector<8x8x8xf32> to vector<64x8xf32>
    %c5_189 = arith.constant 5 : index
    %c0_190 = arith.constant 0 : index
    %c0_191 = arith.constant 0 : index
    %174 = vector.load %arg9[%c5_189, %c0_190, %c0_191] : memref<9x8x8xf32, #tpu.memory_space<vmem>>, vector<1x8x8xf32>
    %175 = vector.shape_cast %174 : vector<1x8x8xf32> to vector<8x8xf32>
    %cst_192 = arith.constant dense<0.000000e+00> : vector<64x8xf32>
    %176 = tpu.matmul %173, %175, %cst_192 {dimension_numbers = #tpu.dot_dimension_numbers<[1], [0], [0], [1], [0, 0, 1, 1], [], []>} : vector<64x8xf32>, vector<8x8xf32>, vector<64x8xf32> -> vector<64x8xf32>
    %177 = arith.addf %171, %176 : vector<64x8xf32>
    %c2_193 = arith.constant 2 : index
    %c7_194 = arith.constant 7 : index
    %c0_195 = arith.constant 0 : index
    %178 = vector.load %arg14[%c2_193, %c7_194, %c0_195] : memref<10x24x8xf32, #tpu.memory_space<vmem>>, vector<8x8x8xf32>
    %179 = vector.shape_cast %178 : vector<8x8x8xf32> to vector<64x8xf32>
    %c6_196 = arith.constant 6 : index
    %c0_197 = arith.constant 0 : index
    %c0_198 = arith.constant 0 : index
    %180 = vector.load %arg9[%c6_196, %c0_197, %c0_198] : memref<9x8x8xf32, #tpu.memory_space<vmem>>, vector<1x8x8xf32>
    %181 = vector.shape_cast %180 : vector<1x8x8xf32> to vector<8x8xf32>
    %cst_199 = arith.constant dense<0.000000e+00> : vector<64x8xf32>
    %182 = tpu.matmul %179, %181, %cst_199 {dimension_numbers = #tpu.dot_dimension_numbers<[1], [0], [0], [1], [0, 0, 1, 1], [], []>} : vector<64x8xf32>, vector<8x8xf32>, vector<64x8xf32> -> vector<64x8xf32>
    %183 = arith.addf %177, %182 : vector<64x8xf32>
    %c2_200 = arith.constant 2 : index
    %c8_201 = arith.constant 8 : index
    %c0_202 = arith.constant 0 : index
    %184 = vector.load %arg14[%c2_200, %c8_201, %c0_202] : memref<10x24x8xf32, #tpu.memory_space<vmem>>, vector<8x8x8xf32>
    %185 = vector.shape_cast %184 : vector<8x8x8xf32> to vector<64x8xf32>
    %c7_203 = arith.constant 7 : index
    %c0_204 = arith.constant 0 : index
    %c0_205 = arith.constant 0 : index
    %186 = vector.load %arg9[%c7_203, %c0_204, %c0_205] : memref<9x8x8xf32, #tpu.memory_space<vmem>>, vector<1x8x8xf32>
    %187 = vector.shape_cast %186 : vector<1x8x8xf32> to vector<8x8xf32>
    %cst_206 = arith.constant dense<0.000000e+00> : vector<64x8xf32>
    %188 = tpu.matmul %185, %187, %cst_206 {dimension_numbers = #tpu.dot_dimension_numbers<[1], [0], [0], [1], [0, 0, 1, 1], [], []>} : vector<64x8xf32>, vector<8x8xf32>, vector<64x8xf32> -> vector<64x8xf32>
    %189 = arith.addf %183, %188 : vector<64x8xf32>
    %c2_207 = arith.constant 2 : index
    %c9_208 = arith.constant 9 : index
    %c0_209 = arith.constant 0 : index
    %190 = vector.load %arg14[%c2_207, %c9_208, %c0_209] : memref<10x24x8xf32, #tpu.memory_space<vmem>>, vector<8x8x8xf32>
    %191 = vector.shape_cast %190 : vector<8x8x8xf32> to vector<64x8xf32>
    %c8_210 = arith.constant 8 : index
    %c0_211 = arith.constant 0 : index
    %c0_212 = arith.constant 0 : index
    %192 = vector.load %arg9[%c8_210, %c0_211, %c0_212] : memref<9x8x8xf32, #tpu.memory_space<vmem>>, vector<1x8x8xf32>
    %193 = vector.shape_cast %192 : vector<1x8x8xf32> to vector<8x8xf32>
    %cst_213 = arith.constant dense<0.000000e+00> : vector<64x8xf32>
    %194 = tpu.matmul %191, %193, %cst_213 {dimension_numbers = #tpu.dot_dimension_numbers<[1], [0], [0], [1], [0, 0, 1, 1], [], []>} : vector<64x8xf32>, vector<8x8xf32>, vector<64x8xf32> -> vector<64x8xf32>
    %195 = arith.addf %189, %194 : vector<64x8xf32>
    %c0_214 = arith.constant 0 : index
    %c0_215 = arith.constant 0 : index
    %196 = vector.load %arg10[%c0_214, %c0_215] : memref<1x8xf32, #tpu.memory_space<vmem>>, vector<1x8xf32>
    %197 = vector.broadcast %196 : vector<1x8xf32> to vector<64x8xf32>
    %198 = arith.addf %195, %197 : vector<64x8xf32>
    %cst_216 = arith.constant 0.000000e+00 : f32
    %199 = vector.broadcast %cst_216 : f32 to vector<64x8xf32>
    %200 = arith.maximumf %198, %199 : vector<64x8xf32>
    %201 = vector.shape_cast %200 : vector<64x8xf32> to vector<8x8x8xf32>
    %c0_217 = arith.constant 0 : index
    %c0_218 = arith.constant 0 : index
    %c0_219 = arith.constant 0 : index
    %c0_220 = arith.constant 0 : index
    %202 = vector.load %arg11[%c0_217, %c0_218, %c0_219, %c0_220] : memref<1x8x8x8xf32, #tpu.memory_space<vmem>>, vector<1x8x8x8xf32>
    %203 = vector.shape_cast %202 : vector<1x8x8x8xf32> to vector<8x8x8xf32>
    %204 = vector.shape_cast %201 : vector<8x8x8xf32> to vector<1x8x8x8xf32>
    tpu.vector_store %arg11[%c0_217, %c0_218, %c0_219, %c0_220], %204 {strides = array<i32>} : memref<1x8x8x8xf32, #tpu.memory_space<vmem>>, vector<1x8x8x8xf32>,
    return
  }
  func.func @transform_0(%arg0: i32) -> (i32, i32, i32, i32) {
    %c0_i32 = arith.constant 0 : i32
    %c0_i32_0 = arith.constant 0 : i32
    %c0_i32_1 = arith.constant 0 : i32
    %c0_i32_2 = arith.constant 0 : i32
    return %arg0, %c0_i32, %c0_i32_0, %c0_i32_1 : i32, i32, i32, i32
  }
  func.func @transform_1(%arg0: i32) -> (i32, i32, i32, i32) {
    %c0_i32 = arith.constant 0 : i32
    %c0_i32_0 = arith.constant 0 : i32
    %c0_i32_1 = arith.constant 0 : i32
    %c0_i32_2 = arith.constant 0 : i32
    return %arg0, %c0_i32, %c0_i32_0, %c0_i32_1 : i32, i32, i32, i32
  }
  func.func @transform_2(%arg0: i32) -> (i32, i32, i32, i32) {
    %c0_i32 = arith.constant 0 : i32
    %c0_i32_0 = arith.constant 0 : i32
    %c0_i32_1 = arith.constant 0 : i32
    %c0_i32_2 = arith.constant 0 : i32
    return %arg0, %c0_i32, %c0_i32_0, %c0_i32_1 : i32, i32, i32, i32
  }
  func.func @transform_3(%arg0: i32) -> (i32, i32, i32, i32) {
    %c0_i32 = arith.constant 0 : i32
    %c0_i32_0 = arith.constant 0 : i32
    %c0_i32_1 = arith.constant 0 : i32
    %c0_i32_2 = arith.constant 0 : i32
    return %arg0, %c0_i32, %c0_i32_0, %c0_i32_1 : i32, i32, i32, i32
  }
  func.func @transform_4(%arg0: i32) -> (i32, i32, i32) {
    %c0_i32 = arith.constant 0 : i32
    %c0_i32_0 = arith.constant 0 : i32
    %c0_i32_1 = arith.constant 0 : i32
    %c0_i32_2 = arith.constant 0 : i32
    return %c0_i32, %c0_i32_0, %c0_i32_1 : i32, i32, i32
  }
  func.func @transform_5(%arg0: i32) -> (i32, i32) {
    %c0_i32 = arith.constant 0 : i32
    %c0_i32_0 = arith.constant 0 : i32
    %c0_i32_1 = arith.constant 0 : i32
    return %c0_i32, %c0_i32_0 : i32, i32
  }
  func.func @transform_6(%arg0: i32) -> (i32, i32, i32) {
    %c0_i32 = arith.constant 0 : i32
    %c0_i32_0 = arith.constant 0 : i32
    %c0_i32_1 = arith.constant 0 : i32
    %c0_i32_2 = arith.constant 0 : i32
    return %c0_i32, %c0_i32_0, %c0_i32_1 : i32, i32, i32
  }
  func.func @transform_7(%arg0: i32) -> (i32, i32) {
    %c0_i32 = arith.constant 0 : i32
    %c0_i32_0 = arith.constant 0 : i32
    %c0_i32_1 = arith.constant 0 : i32
    return %c0_i32, %c0_i32_0 : i32, i32
  }
  func.func @transform_8(%arg0: i32) -> (i32, i32, i32) {
    %c0_i32 = arith.constant 0 : i32
    %c0_i32_0 = arith.constant 0 : i32
    %c0_i32_1 = arith.constant 0 : i32
    %c0_i32_2 = arith.constant 0 : i32
    return %c0_i32, %c0_i32_0, %c0_i32_1 : i32, i32, i32
  }
  func.func @transform_9(%arg0: i32) -> (i32, i32) {
    %c0_i32 = arith.constant 0 : i32
    %c0_i32_0 = arith.constant 0 : i32
    %c0_i32_1 = arith.constant 0 : i32
    return %c0_i32, %c0_i32_0 : i32, i32
  }
  func.func @transform_10(%arg0: i32) -> (i32, i32, i32, i32) {
    %c0_i32 = arith.constant 0 : i32
    %c0_i32_0 = arith.constant 0 : i32
    %c0_i32_1 = arith.constant 0 : i32
    %c0_i32_2 = arith.constant 0 : i32
    return %arg0, %c0_i32, %c0_i32_0, %c0_i32_1 : i32, i32, i32, i32
  }
  func.func @transform_11(%arg0: i32) -> (i32, i32, i32, i32) {
    %c0_i32 = arith.constant 0 : i32
    %c0_i32_0 = arith.constant 0 : i32
    %c0_i32_1 = arith.constant 0 : i32
    %c0_i32_2 = arith.constant 0 : i32
    return %arg0, %c0_i32, %c0_i32_0, %c0_i32_1 : i32, i32, i32, i32
  }
}

</mosaic_0001>

<bundles_post_ra>
// kernel: down_forward.1
= control target key start
LH: loop header
LB: loop body
LE: loop exit
PB: predicated region body
PF: predicated region fallthrough
CT: control target
= control target key end

     0   :  { %s3373_s17 = smov 0   ;;  %s4499_s0 = inlined_call_operand.vmem [shape: f32[2,9,9,4], index: 0, kind: input, shape index: {}]   ;;  %s4500_s1 = inlined_call_operand.vmem [shape: f32[2,9,9,4], index: 1, kind: input, shape index: {}]   ;;  %s4501_s2 = inlined_call_operand.vmem [shape: f32[2,9,9,4], index: 2, kind: input, shape index: {}]   ;;  %s4502_s3 = inlined_call_operand.vmem [shape: f32[2,9,9,4], index: 3, kind: input, shape index: {}]   ;;  %s4503_s4 = inlined_call_operand.vmem [shape: f32[9,4,4], index: 4, kind: input, shape index: {}]   ;;  %s4504_s5 = inlined_call_operand.vmem [shape: f32[1,4], index: 5, kind: input, shape index: {}]   ;;  %s4505_s6 = inlined_call_operand.vmem [shape: f32[9,4,8], index: 6, kind: input, shape index: {}]   ;;  %s4506_s7 = inlined_call_operand.vmem [shape: f32[1,8], index: 7, kind: input, shape index: {}]   ;;  %s4507_s8 = inlined_call_operand.vmem [shape: f32[9,8,8], index: 8, kind: input, shape index: {}]   ;;  %s4508_s9 = inlined_call_operand.vmem [shape: f32[1,8], index: 9, kind: input, shape index: {}]   ;;  %s4509_s10 = inlined_call_operand.vmem [shape: f32[2,8,8,8], index: 10, kind: output, shape index: {0}]   ;;  %s4510_s11 = inlined_call_operand.vmem [shape: f32[2,8,8,4], index: 11, kind: output, shape index: {1}]  }
   0x1 LB: > { %s2989_s18 = sadd.s32 4294967295, %s3310_s17   ;;  %p2993_p0 = scmp.ge.s32.totalorder %s3310_s17, 1  ;;  %s3310_s17 = sphi %s3373_s17, %s22_s17  }
   0x2   : > { %p370_p1 = scmp.lt.s32.totalorder %s3310_s17, 3 }
   0x4   : > { %p371_p2 = pnand %p2993_p0, %p370_p1 }
   0x5   : > { %p430_p3 = scmp.lt.s32.totalorder (!%p371_p2), %s2989_s18, 1 }
   0x6   : > { %374 = sbr.rel (%p371_p2) target bundleno = 852 (0x354), region = 60 }
   0xb   : > { %v3002_v0 = vld [vmem:[%s4503_s4 + $0x4] sm:$0xf]  ;;  %vm504_vm0 = vcmask 1043456   ;;  %v468_v1 = vld [vmem:[%s4503_s4] sm:$0xf]  ;;  %s4512_s18 = smov (!%p430_p3, %s2989_s18), 1 }
   0xc   : > { %3288 = vmatpush.msk.msra.mxu3 %vm504_vm0, %v3002_v0  ;;  %v3021_v2 = vld [vmem:[%s4503_s4 + $0x8] sm:$0xf]  ;;  %3003 = vmatpush.msk.msra.mxu0 %vm504_vm0, %v3002_v0  ;;  %v3041_v3 = vld [vmem:[%s4503_s4 + $0x10] sm:$0xf]  ;;  %s3402_s27 = smul.u32 144, %s4512_s18  ;;  %vm479_vm1 = vcmask 31744  }
   0xd   : > { %3022 = vmatpush.msk.msra.mxu2 %vm504_vm0, %v3021_v2  ;;  %3012 = vmatpush.msk.msra.mxu1 %vm504_vm0, %v468_v1  ;;  %v3031_v16 = vld [vmem:[%s4503_s4 + $0xc] sm:$0xf]  ;;  %v3069_v17 = vld [vmem:[%s4503_s4 + $0x18] sm:$0xf]  ;;  %v3105_v22 = vld [vmem:[%s4503_s4 + $0x20] sm:$0xf] }
   0xe   : > { %3289 = vmatpush.msk.msrb.mxu3 %vm504_vm0, %v468_v1  ;;  %3042 = vmatpush.msk.msrb.mxu0 %vm504_vm0, %v3041_v3  ;;  %s3408_s30 = scalar_lea.vmem %s4499_s0, %s3402_s27  ;;  %s3414_s14 = scalar_lea.vmem %s4500_s1, %s3402_s27  ;;  %v3051_v23 = vld [vmem:[%s4503_s4 + $0x14] sm:$0xf]  ;;  %v3087_v28 = vld [vmem:[%s4503_s4 + $0x1c] sm:$0xf]  ;;  %vm2066_vm2 = vcmask 64512  }
   0xf   : > { %v3417_v4 = vld [vmem:[%s3414_s14 + $0x60] sm:$0xff]  ;;  %v3429_v8 = vld [vmem:[%s3414_s14 + $0x70] sm:$0xff]  ;;  %3070 = vmatpush.msk.msrb.mxu2 %vm504_vm0, %v3069_v17  ;;  %3052 = vmatpush.msk.msrb.mxu1 %vm504_vm0, %v3051_v23  ;;  %s3537_s12 = scalar_lea.vmem %s4501_s2, %s3402_s27  ;;  %s3543_s16 = scalar_lea.vmem %s4502_s3, %s3402_s27 }
  0x10   : > { %v617_v5 = vld [vmem:[%s3408_s30 + $0x1] sm:$0xff]  ;;  %3010 = vmatmul.msk.f32.vlgmr.msra.gmra.mxu3 %vm479_vm1, %v3417_v4  ;;  %v3432_v9 = vld [vmem:[%s3408_s30 + $0x11] sm:$0xff]  ;;  %s3286_s29 = sshll.u32 %s4512_s18, 6 }
  0x11   : > { %v469_v6 = vld [vmem:[%s3414_s14] sm:$0xff]  ;;  %3023 = vmatmul.msk.f32.vlgmr.msra.gmra.mxu2 %vm479_vm1, %v617_v5  ;;  %3290 = vmatpush.msk.msra.mxu3 %vm504_vm0, %v3021_v2  ;;  %v3435_v10 = vld [vmem:[%s3414_s14 + $0x10] sm:$0xff]  ;;  %s3827_s15 = scalar_lea.vmem %s4510_s11, %s3286_s29 }
  0x12   : > { %v460_v7 = vld [vmem:[%s3408_s30] sm:$0xff]  ;;  %3004 = vmatmul.msk.f32.vlgmr.msra.gmra.mxu0 %vm479_vm1, %v469_v6  ;;  %v461_v11 = vld [vmem:[%s3408_s30 + $0x10] sm:$0xff] }
  0x13   : > { %3013 = vmatmul.msk.f32.vlgmr.msra.gmra.mxu1 %vm479_vm1, %v460_v7  ;;  %v3446_v12 = vld [vmem:[%s3408_s30 + $0x60] sm:$0xff]  ;;  %v3471_v18 = vld [vmem:[%s3408_s30 + $0x70] sm:$0xff]  ;;  %3106 = vmatpush.msk.msra.mxu0 %vm504_vm0, %v3105_v22 }
  0x14   : > { %v3449_v13 = vld [vmem:[%s3408_s30 + $0x21] sm:$0xff]  ;;  %v3474_v19 = vld [vmem:[%s3408_s30 + $0x31] sm:$0xff] }
  0x15   : > { %v3452_v14 = vld [vmem:[%s3414_s14 + $0x20] sm:$0xff]  ;;  %v3477_v20 = vld [vmem:[%s3414_s14 + $0x30] sm:$0xff] }
  0x16   : > { %v462_v15 = vld [vmem:[%s3408_s30 + $0x20] sm:$0xff]  ;;  %v463_v21 = vld [vmem:[%s3408_s30 + $0x30] sm:$0xff] }
  0x17   : > { %v3496_v24 = vld [vmem:[%s3408_s30 + $0x61] sm:$0xff]  ;;  %v3517_v29 = vld [vmem:[%s3408_s30 + $0x71] sm:$0xff] }
  0x18   : > { %3011 = vmatmul.msk.f32.gmra.mxu3 %vm479_vm1, %v3429_v8  ;;  %v3499_v25 = vld [vmem:[%s3408_s30 + $0x41] sm:$0xff]  ;;  %v3520_v30 = vld [vmem:[%s3408_s30 + $0x51] sm:$0xff] }
  0x19   : > { %3024 = vmatmul.msk.f32.gmra.mxu2 %vm479_vm1, %v3432_v9  ;;  %v3502_v26 = vld [vmem:[%s3414_s14 + $0x40] sm:$0xff]  ;;  %v3523_v31 = vld [vmem:[%s3414_s14 + $0x50] sm:$0xff] }
  0x1a   : > { %3005 = vmatmul.msk.f32.gmra.mxu0 %vm479_vm1, %v3435_v10  ;;  %v464_v27 = vld [vmem:[%s3408_s30 + $0x40] sm:$0xff]  ;;  %v465_v32 = vld [vmem:[%s3408_s30 + $0x50] sm:$0xff] }
  0x1b   : > { %3014 = vmatmul.msk.f32.gmra.mxu1 %vm479_vm1, %v461_v11  ;;  %v703_v33 = vld [vmem:[%s3537_s12] sm:$0xff]  ;;  %v704_v36 = vld [vmem:[%s3537_s12 + $0x10] sm:$0xff] }
  0x1c   : > { %v789_v34 = vld [vmem:[%s3543_s16] sm:$0xff]  ;;  %v790_v37 = vld [vmem:[%s3543_s16 + $0x10] sm:$0xff] }
  0x1d   : > { %v875_v35 = vld [vmem:[%s3537_s12 + $0x1] sm:$0xff]  ;;  %v876_v38 = vld [vmem:[%s3537_s12 + $0x11] sm:$0xff] }
  0x1e   : > { %v705_v39 = vld [vmem:[%s3537_s12 + $0x20] sm:$0xff]  ;;  %v706_v42 = vld [vmem:[%s3537_s12 + $0x30] sm:$0xff] }
  0x1f   : > { %v791_v40 = vld [vmem:[%s3543_s16 + $0x20] sm:$0xff]  ;;  %v792_v43 = vld [vmem:[%s3543_s16 + $0x30] sm:$0xff] }
  0x20   : > { %3019 = vmatmul.msk.f32.vlgmr.msrb.gmra.mxu3 %vm479_vm1, %v3446_v12  ;;  %v877_v41 = vld [vmem:[%s3537_s12 + $0x21] sm:$0xff]  ;;  %v878_v44 = vld [vmem:[%s3537_s12 + $0x31] sm:$0xff] }
  0x21   : > { %3025 = vmatmul.msk.f32.gmra.mxu2 %vm479_vm1, %v3449_v13  ;;  %3032 = vmatpush.msk.msrb.mxu3 %vm504_vm0, %v3031_v16  ;;  %v707_v45 = vld [vmem:[%s3537_s12 + $0x40] sm:$0xff]  ;;  %v708_v48 = vld [vmem:[%s3537_s12 + $0x50] sm:$0xff] }
  0x22   : > { %3006 = vmatmul.msk.f32.gmra.mxu0 %vm479_vm1, %v3452_v14  ;;  %v793_v46 = vld [vmem:[%s3543_s16 + $0x40] sm:$0xff]  ;;  %v794_v49 = vld [vmem:[%s3543_s16 + $0x50] sm:$0xff] }
  0x23   : > { %3015 = vmatmul.msk.f32.gmra.mxu1 %vm479_vm1, %v462_v15  ;;  %v879_v47 = vld [vmem:[%s3537_s12 + $0x41] sm:$0xff]  ;;  %v880_v50 = vld [vmem:[%s3537_s12 + $0x51] sm:$0xff] }
  0x24   : > { %v709_v51 = vld [vmem:[%s3537_s12 + $0x60] sm:$0xff]  ;;  %v710_v54 = vld [vmem:[%s3537_s12 + $0x70] sm:$0xff] }
  0x25   : > { %v795_v52 = vld [vmem:[%s3543_s16 + $0x60] sm:$0xff]  ;;  %v796_v56 = vld [vmem:[%s3543_s16 + $0x70] sm:$0xff]  ;;  %s4452_s16 = scalar_lea.vmem %s4509_s10, %s3286_s29 }
  0x26   : > { %v881_v53 = vld [vmem:[%s3537_s12 + $0x61] sm:$0xff]  ;;  %v882_v57 = vld [vmem:[%s3537_s12 + $0x71] sm:$0xff] }
  0x27   : > { %v3068_v55 = vld [vmem:[%s3408_s30 + $0x80] sm:$0xff] }
  0x28   : > { %3020 = vmatmul.msk.f32.gmra.mxu3 %vm479_vm1, %v3471_v18  ;;  %v3115_v2 = vld [vmem:[%s4505_s6 + $0x4] sm:$0xf] }
  0x29   : > { %3026 = vmatmul.msk.f32.gmra.mxu2 %vm479_vm1, %v3474_v19  ;;  %3116 = vmatpush.msk.msra.mxu1 %vm504_vm0, %v3115_v2  ;;  %v3086_v6 = vld [vmem:[%s3414_s14 + $0x80] sm:$0xff] }
  0x2a   : > { %3007 = vmatmul.msk.f32.gmra.mxu0 %vm479_vm1, %v3477_v20 }
  0x2b   : > { %3016 = vmatmul.msk.f32.gmra.mxu1 %vm479_vm1, %v463_v21 }
  0x30   : > { %3029 = vmatmul.msk.f32.vlgmr.msra.gmra.mxu3 %vm479_vm1, %v3496_v24 }
  0x31   : > { %3027 = vmatmul.msk.f32.gmra.mxu2 %vm479_vm1, %v3499_v25  ;;  %3088 = vmatpush.msk.msra.mxu3 %vm504_vm0, %v3087_v28 }
  0x32   : > { %3008 = vmatmul.msk.f32.gmra.mxu0 %vm479_vm1, %v3502_v26 }
  0x33   : > { %3017 = vmatmul.msk.f32.gmra.mxu1 %vm479_vm1, %v464_v27 }
  0x38   : > { %3030 = vmatmul.msk.f32.gmra.mxu3 %vm479_vm1, %v3517_v29 }
  0x39   : > { %3028 = vmatmul.msk.f32.gmra.mxu2 %vm479_vm1, %v3520_v30 }
  0x3a   : > { %3009 = vmatmul.msk.f32.gmra.mxu0 %vm479_vm1, %v3523_v31 }
  0x3b   : > { %3018 = vmatmul.msk.f32.gmra.mxu1 %vm479_vm1, %v465_v32 }
  0x40   : > { %3033 = vmatmul.msk.f32.vlgmr.msrb.gmra.mxu3 %vm479_vm1, %v703_v33 }
  0x41   : > { %3071 = vmatmul.msk.f32.vlgmr.msrb.gmra.mxu2 %vm479_vm1, %v461_v11 }
  0x42   : > { %3043 = vmatmul.msk.f32.vlgmr.msrb.gmra.mxu0 %vm479_vm1, %v789_v34 }
  0x43   : > { %3053 = vmatmul.msk.f32.vlgmr.msrb.gmra.mxu1 %vm479_vm1, %v875_v35 }
  0x48   : > { %3034 = vmatmul.msk.f32.gmra.mxu3 %vm479_vm1, %v704_v36 }
  0x49   : > { %3072 = vmatmul.msk.f32.gmra.mxu2 %vm479_vm1, %v462_v15 }
  0x4a   : > { %3044 = vmatmul.msk.f32.gmra.mxu0 %vm479_vm1, %v790_v37 }
  0x4b   : > { %3054 = vmatmul.msk.f32.gmra.mxu1 %vm479_vm1, %v876_v38 }
  0x50   : > { %3035 = vmatmul.msk.f32.gmra.mxu3 %vm479_vm1, %v705_v39 }
  0x51   : > { %3073 = vmatmul.msk.f32.gmra.mxu2 %vm479_vm1, %v463_v21 }
  0x52   : > { %3045 = vmatmul.msk.f32.gmra.mxu0 %vm479_vm1, %v791_v40  ;;  %v3144_v40 = vld [vmem:[%s4505_s6 + $0xc] sm:$0xf] }
  0x53   : > { %3055 = vmatmul.msk.f32.gmra.mxu1 %vm479_vm1, %v877_v41  ;;  %v3154_v41 = vld [vmem:[%s4505_s6 + $0x10] sm:$0xf]  ;;  %3145 = vmatpush.msk.msrb.mxu0 %vm504_vm0, %v3144_v40 }
  0x54   : > { %3155 = vmatpush.msk.msrb.mxu1 %vm504_vm0, %v3154_v41 }
  0x58   : > { %3036 = vmatmul.msk.f32.gmra.mxu3 %vm479_vm1, %v706_v42 }
  0x59   : > { %3074 = vmatmul.msk.f32.gmra.mxu2 %vm479_vm1, %v464_v27  ;;  %v3312_v27 = vmov 0.0  }
  0x5a   : > { %3046 = vmatmul.msk.f32.gmra.mxu0 %vm479_vm1, %v792_v43  ;;  %1253 = vst.msk [vmem:[#allocation2 + $0x20] sm:$0xff] %vm479_vm1, %v3312_v27 }
  0x5b   : > { %3056 = vmatmul.msk.f32.gmra.mxu1 %vm479_vm1, %v878_v44  ;;  %1249 = vst.msk [vmem:[#allocation2] sm:$0xff] %vm479_vm1, %v3312_v27 }
  0x5c   : > { %1250 = vst.msk [vmem:[#allocation2 + $0x8] sm:$0xff] %vm479_vm1, %v3312_v27 }
  0x5d   : > { %1251 = vst.msk [vmem:[#allocation2 + $0x10] sm:$0xff] %vm479_vm1, %v3312_v27 }
  0x5e   : > { %1252 = vst.msk [vmem:[#allocation2 + $0x18] sm:$0xff] %vm479_vm1, %v3312_v27 }
  0x5f   : > { %1254 = vst.msk [vmem:[#allocation2 + $0x28] sm:$0xff] %vm479_vm1, %v3312_v27 }
  0x60   : > { %3037 = vmatmul.msk.f32.gmra.mxu3 %vm479_vm1, %v707_v45  ;;  %1255 = vst.msk [vmem:[#allocation2 + $0x30] sm:$0xff] %vm479_vm1, %v3312_v27 }
  0x61   : > { %3075 = vmatmul.msk.f32.gmra.mxu2 %vm479_vm1, %v465_v32  ;;  %1256 = vst.msk [vmem:[#allocation2 + $0x38] sm:$0xff] %vm479_vm1, %v3312_v27 }
  0x62   : > { %3047 = vmatmul.msk.f32.gmra.mxu0 %vm479_vm1, %v793_v46  ;;  %1257 = vst.msk [vmem:[#allocation2 + $0x40] sm:$0xff] %vm479_vm1, %v3312_v27 }
  0x63   : > { %3057 = vmatmul.msk.f32.gmra.mxu1 %vm479_vm1, %v879_v47  ;;  %1258 = vst.msk [vmem:[#allocation2 + $0x48] sm:$0xff] %vm479_vm1, %v3312_v27  ;;  %v1288_v34 = vld [vmem:[#allocation2 + $0x7] sm:$0xff] }
  0x64   : > { %1259 = vst.msk [vmem:[#allocation2 + $0x50] sm:$0xff] %vm479_vm1, %v3312_v27  ;;  %v1443_v35 = vld [vmem:[#allocation2 + $0x9] sm:$0xff] }
  0x65   : > { %1260 = vst.msk [vmem:[#allocation2 + $0x58] sm:$0xff] %vm479_vm1, %v3312_v27  ;;  %v1297_v38 = vld [vmem:[#allocation2 + $0x8] sm:$0xff] }
  0x66   : > { %1261 = vst.msk [vmem:[#allocation2 + $0x60] sm:$0xff] %vm479_vm1, %v3312_v27 }
  0x67   : > { %1262 = vst.msk [vmem:[#allocation2 + $0x68] sm:$0xff] %vm479_vm1, %v3312_v27 }
  0x68   : > { %3038 = vmatmul.msk.f32.gmra.mxu3 %vm479_vm1, %v708_v48  ;;  %1263 = vst.msk [vmem:[#allocation2 + $0x70] sm:$0xff] %vm479_vm1, %v3312_v27 }
  0x69   : > { %3076 = vmatmul.msk.f32.gmra.mxu2 %vm479_vm1, %v3446_v12  ;;  %1264 = vst.msk [vmem:[#allocation2 + $0x78] sm:$0xff] %vm479_vm1, %v3312_v27 }
  0x6a   : > { %3048 = vmatmul.msk.f32.gmra.mxu0 %vm479_vm1, %v794_v49  ;;  %1265 = vst.msk [vmem:[#allocation2 + $0x80] sm:$0xff] %vm479_vm1, %v3312_v27 }
  0x6b   : > { %3058 = vmatmul.msk.f32.gmra.mxu1 %vm479_vm1, %v880_v50  ;;  %1266 = vst.msk [vmem:[#allocation2 + $0x88] sm:$0xff] %vm479_vm1, %v3312_v27 }
  0x6c   : > { %1267 = vst.msk [vmem:[#allocation2 + $0x90] sm:$0xff] %vm479_vm1, %v3312_v27 }
  0x6d   : > { %1268 = vst.msk [vmem:[#allocation2 + $0x98] sm:$0xff] %vm479_vm1, %v3312_v27 }
  0x6e   : > { %1269 = vst.msk [vmem:[#allocation2 + $0xa0] sm:$0xff] %vm479_vm1, %v3312_v27 }
  0x6f   : > { %1270 = vst.msk [vmem:[#allocation2 + $0xa8] sm:$0xff] %vm479_vm1, %v3312_v27 }
  0x70   : > { %3039 = vmatmul.msk.f32.gmra.mxu3 %vm479_vm1, %v709_v51  ;;  %1271 = vst.msk [vmem:[#allocation2 + $0xb0] sm:$0xff] %vm479_vm1, %v3312_v27 }
  0x71   : > { %3077 = vmatmul.msk.f32.gmra.mxu2 %vm479_vm1, %v3471_v18  ;;  %1272 = vst.msk [vmem:[#allocation2 + $0xb8] sm:$0xff] %vm479_vm1, %v3312_v27 }
  0x72   : > { %3049 = vmatmul.msk.f32.gmra.mxu0 %vm479_vm1, %v795_v52  ;;  %1273 = vst.msk [vmem:[#allocation2 + $0xc0] sm:$0xff] %vm479_vm1, %v3312_v27 }
  0x73   : > { %3059 = vmatmul.msk.f32.gmra.mxu1 %vm479_vm1, %v881_v53  ;;  %1274 = vst.msk [vmem:[#allocation2 + $0xc8] sm:$0xff] %vm479_vm1, %v3312_v27 }
  0x74   : > { %1275 = vst.msk [vmem:[#allocation2 + $0xd0] sm:$0xff] %vm479_vm1, %v3312_v27 }
  0x75   : > { %1276 = vst.msk [vmem:[#allocation2 + $0xd8] sm:$0xff] %vm479_vm1, %v3312_v27 }
  0x76   : > { %1277 = vst.msk [vmem:[#allocation2 + $0xe0] sm:$0xff] %vm479_vm1, %v3312_v27 }
  0x77   : > { %1278 = vst.msk [vmem:[#allocation2 + $0xe8] sm:$0xff] %vm479_vm1, %v3312_v27 }
  0x78   : > { %3040 = vmatmul.msk.f32.gmra.mxu3 %vm479_vm1, %v710_v54  ;;  %2071 = vst.msk [vmem:[#allocation3 + $0x20] sm:$0xff] %vm2066_vm2, %v3312_v27 }
  0x79   : > { %3078 = vmatmul.msk.f32.gmra.mxu2 %vm479_vm1, %v3068_v55  ;;  %2067 = vst.msk [vmem:[#allocation3] sm:$0xff] %vm2066_vm2, %v3312_v27 }
  0x7a   : > { %3050 = vmatmul.msk.f32.gmra.mxu0 %vm479_vm1, %v796_v56  ;;  %2068 = vst.msk [vmem:[#allocation3 + $0x8] sm:$0xff] %vm2066_vm2, %v3312_v27 }
  0x7b   : > { %3060 = vmatmul.msk.f32.gmra.mxu1 %vm479_vm1, %v882_v57  ;;  %2069 = vst.msk [vmem:[#allocation3 + $0x10] sm:$0xff] %vm2066_vm2, %v3312_v27 }
  0x7c   : > { %2070 = vst.msk [vmem:[#allocation3 + $0x18] sm:$0xff] %vm2066_vm2, %v3312_v27 }
  0x7d   : > { %2072 = vst.msk [vmem:[#allocation3 + $0x28] sm:$0xff] %vm2066_vm2, %v3312_v27 }
  0x7e   : > { %2073 = vst.msk [vmem:[#allocation3 + $0x30] sm:$0xff] %vm2066_vm2, %v3312_v27 }
  0x7f   : > { %2074 = vst.msk [vmem:[#allocation3 + $0x38] sm:$0xff] %vm2066_vm2, %v3312_v27 }
  0x80   : > { %3089 = vmatmul.msk.f32.vlgmr.msra.gmra.mxu3 %vm479_vm1, %v3435_v10  ;;  %2075 = vst.msk [vmem:[#allocation3 + $0x40] sm:$0xff] %vm2066_vm2, %v3312_v27 }
  0x81   : > { %2076 = vst.msk [vmem:[#allocation3 + $0x48] sm:$0xff] %vm2066_vm2, %v3312_v27 }
  0x82   : > { %3107 = vmatmul.msk.f32.vlgmr.msra.gmra.mxu0 %vm479_vm1, %v3432_v9  ;;  %v3104_v9 = vld [vmem:[%s3408_s30 + $0x81] sm:$0xff]  ;;  %2077 = vst.msk [vmem:[#allocation3 + $0x50] sm:$0xff] %vm2066_vm2, %v3312_v27 }
  0x83   : > { %3117 = vmatmul.msk.f32.vlgmr.msra.gmra.mxu1 %vm479_vm1, %v1297_v38  ;;  %2078 = vst.msk [vmem:[#allocation3 + $0x58] sm:$0xff] %vm2066_vm2, %v3312_v27 }
  0x84   : > { %2079 = vst.msk [vmem:[#allocation3 + $0x60] sm:$0xff] %vm2066_vm2, %v3312_v27 }
  0x85   : > { %2080 = vst.msk [vmem:[#allocation3 + $0x68] sm:$0xff] %vm2066_vm2, %v3312_v27 }
  0x86   : > { %2081 = vst.msk [vmem:[#allocation3 + $0x70] sm:$0xff] %vm2066_vm2, %v3312_v27 }
  0x87   : > { %2082 = vst.msk [vmem:[#allocation3 + $0x78] sm:$0xff] %vm2066_vm2, %v3312_v27 }
  0x88   : > { %3090 = vmatmul.msk.f32.gmra.mxu3 %vm479_vm1, %v3452_v14  ;;  %2083 = vst.msk [vmem:[#allocation3 + $0x80] sm:$0xff] %vm2066_vm2, %v3312_v27 }
  0x89   : > { %2084 = vst.msk [vmem:[#allocation3 + $0x88] sm:$0xff] %vm2066_vm2, %v3312_v27 }
  0x8a   : > { %3108 = vmatmul.msk.f32.gmra.mxu0 %vm479_vm1, %v3449_v13  ;;  %2085 = vst.msk [vmem:[#allocation3 + $0x90] sm:$0xff] %vm2066_vm2, %v3312_v27 }
  0x8b   : > { %2086 = vst.msk [vmem:[#allocation3 + $0x98] sm:$0xff] %vm2066_vm2, %v3312_v27 }
  0x8c   : > { %2087 = vst.msk [vmem:[#allocation3 + $0xa0] sm:$0xff] %vm2066_vm2, %v3312_v27 }
  0x8d   : > { %2088 = vst.msk [vmem:[#allocation3 + $0xa8] sm:$0xff] %vm2066_vm2, %v3312_v27 }
  0x8e   : > { %2089 = vst.msk [vmem:[#allocation3 + $0xb0] sm:$0xff] %vm2066_vm2, %v3312_v27 }
  0x8f   : > { %v3612_v58 = vpop.f32.mrf.mxu0  ;;  %2090 = vst.msk [vmem:[#allocation3 + $0xb8] sm:$0xff] %vm2066_vm2, %v3312_v27 }
  0x90   : > { %3091 = vmatmul.msk.f32.gmra.mxu3 %vm479_vm1, %v3477_v20  ;;  %2091 = vst.msk [vmem:[#allocation3 + $0xc0] sm:$0xff] %vm2066_vm2, %v3312_v27 }
  0x91   : > { %2092 = vst.msk [vmem:[#allocation3 + $0xc8] sm:$0xff] %vm2066_vm2, %v3312_v27 }
  0x92   : > { %3109 = vmatmul.msk.f32.gmra.mxu0 %vm479_vm1, %v3474_v19  ;;  %2093 = vst.msk [vmem:[#allocation3 + $0xd0] sm:$0xff] %vm2066_vm2, %v3312_v27 }
  0x93   : > { %v3618_v59 = vpop.f32.mrf.mxu3  ;;  %2094 = vst.msk [vmem:[#allocation3 + $0xd8] sm:$0xff] %vm2066_vm2, %v3312_v27 }
  0x94   : > { %v3662_v10 = vpop.f32.mrf.mxu2  ;;  %2095 = vst.msk [vmem:[#allocation3 + $0xe0] sm:$0xff] %vm2066_vm2, %v3312_v27 }
  0x95   : > { %2096 = vst.msk [vmem:[#allocation3 + $0xe8] sm:$0xff] %vm2066_vm2, %v3312_v27 }
  0x97   : > { %v3620_v60 = vpop.f32.mrf.mxu0 }
  0x98   : > { %3092 = vmatmul.msk.f32.gmra.mxu3 %vm479_vm1, %v3502_v26 }
  0x9a   : > { %3110 = vmatmul.msk.f32.gmra.mxu0 %vm479_vm1, %v3499_v25 }
  0x9b   : > { %v3626_v61 = vpop.f32.mrf.mxu3 }
  0x9c   : > { %v3672_v13 = vpop.f32.mrf.mxu2 }
  0x9f   : > { %v3628_v62 = vpop.f32.mrf.mxu0 }
  0xa0   : > { %3093 = vmatmul.msk.f32.gmra.mxu3 %vm479_vm1, %v3523_v31 }
  0xa2   : > { %3111 = vmatmul.msk.f32.gmra.mxu0 %vm479_vm1, %v3520_v30  ;;  %v3134_v30 = vld [vmem:[%s4505_s6 + $0x8] sm:$0xf] }
  0xa3   : > { %v3634_v63 = vpop.f32.mrf.mxu3  ;;  %3135 = vmatpush.msk.msrb.mxu3 %vm504_vm0, %v3134_v30 }
  0xa4   : > { %v3680_v17 = vpop.f32.mrf.mxu2 }
  0xa7   : > { %v3636_v0 = vpop.f32.mrf.mxu0 }
  0xa8   : > { %3094 = vmatmul.msk.f32.gmra.mxu3 %vm479_vm1, %v3417_v4  ;;  %v3654_v4 = vpop.f32.mrf.mxu1 }
  0xa9   : > { %v594_v43 = vadd.f32 %v3654_v4, %v3612_v58 }
  0xaa   : > { %3112 = vmatmul.msk.f32.gmra.mxu0 %vm479_vm1, %v3496_v24 }
  0xab   : > { %v3642_v1 = vpop.f32.mrf.mxu3  ;;  %v695_v46 = vadd.f32 %v3662_v10, %v594_v43 }
  0xac   : > { %v3690_v22 = vpop.f32.mrf.mxu2 }
  0xaf   : > { %v3648_v3 = vpop.f32.mrf.mxu0 }
  0xb0   : > { %3095 = vmatmul.msk.f32.gmra.mxu3 %vm479_vm1, %v3429_v8  ;;  %v3668_v8 = vpop.f32.mrf.mxu1 }
  0xb1   : > { %v597_v50 = vadd.f32 %v3668_v8, %v3620_v60  ;;  %v3815_v8 = vld [vmem:[%s4504_s5] ss:$0 sm:$0xff] }
  0xb2   : > { %3113 = vmatmul.msk.f32.gmra.mxu0 %vm479_vm1, %v3517_v29  ;;  %v1296_v29 = vld [vmem:[%s4505_s6] sm:$0xf] }
  0xb3   : > { %v3656_v5 = vpop.f32.mrf.mxu3  ;;  %3125 = vmatpush.msk.msra.mxu2 %vm504_vm0, %v1296_v29  ;;  %v696_v54 = vadd.f32 %v3672_v13, %v597_v50 }
  0xb4   : > { %v3702_v28 = vpop.f32.mrf.mxu2  ;;  %3126 = vmatmul.msk.f32.vlgmr.msra.gmra.mxu2 %vm479_vm1, %v1288_v34 }
  0xb7   : > { %v3659_v7 = vpop.f32.mrf.mxu0 }
  0xb8   : > { %3096 = vmatmul.msk.f32.gmra.mxu3 %vm479_vm1, %v3086_v6  ;;  %v3678_v16 = vpop.f32.mrf.mxu1 }
  0xb9   : > { %v600_v58 = vadd.f32 %v3678_v16, %v3628_v62 }
  0xba   : > { %3114 = vmatmul.msk.f32.gmra.mxu0 %vm479_vm1, %v3104_v9 }
  0xbb   : > { %v3666_v11 = vpop.f32.mrf.mxu3  ;;  %v697_v9 = vadd.f32 %v3680_v17, %v600_v58 }
  0xbc   : > { %v3739_v36 = vpop.f32.mrf.mxu2 }
  0xbf   : > { %v3670_v12 = vpop.f32.mrf.mxu0 }
  0xc0   : > { %v3686_v20 = vpop.f32.mrf.mxu1  ;;  %3136 = vmatmul.msk.f32.vlgmr.msrb.gmra.mxu3 %vm479_vm1, %v1443_v35 }
  0xc3   : > { %v3674_v14 = vpop.f32.mrf.mxu3 }
  0xc4   : > { %v1016_v44 = vpop.f32.mrf.mxu2  ;;  %v781_v47 = vadd.f32 %v3674_v14, %v695_v46 }
  0xc6   : > { %v867_v51 = vadd.f32 %v3670_v12, %v781_v47 }
  0xc7   : > { %v3676_v15 = vpop.f32.mrf.mxu0 }
  0xc8   : > { %v3694_v24 = vpop.f32.mrf.mxu1 }
  0xcb   : > { %v3682_v18 = vpop.f32.mrf.mxu3 }
  0xcc   : > { %v1019_v52 = vpop.f32.mrf.mxu2  ;;  %v782_v56 = vadd.f32 %v3682_v18, %v696_v54  ;;  %v603_v18 = vadd.f32 %v3686_v20, %v3636_v0 }
  0xce   : > { %v868_v4 = vadd.f32 %v3676_v15, %v782_v56  ;;  %v698_v35 = vadd.f32 %v3690_v22, %v603_v18 }
  0xcf   : > { %v3684_v19 = vpop.f32.mrf.mxu0 }
  0xd0   : > { %v3726_v32 = vpop.f32.mrf.mxu1 }
  0xd3   : > { %v3688_v21 = vpop.f32.mrf.mxu3 }
  0xd4   : > { %v1022_v12 = vpop.f32.mrf.mxu2  ;;  %v783_v14 = vadd.f32 %v3688_v21, %v697_v9 }
  0xd6   : > { %v869_v29 = vadd.f32 %v3684_v19, %v783_v14  ;;  %v606_v19 = vadd.f32 %v3694_v24, %v3648_v3 }
  0xd7   : > { %v3692_v23 = vpop.f32.mrf.mxu0 }
  0xd8   : > { %v929_v39 = vpop.f32.mrf.mxu1 }
  0xd9   : > { %v953_v55 = vadd.f32 %v929_v39, %v867_v51 }
  0xdb   : > { %v3696_v25 = vpop.f32.mrf.mxu3  ;;  %v1040_v2 = vadd.f32 %v1016_v44, %v953_v55  ;;  %v609_v55 = vadd.f32 %v3726_v32, %v3659_v7 }
  0xdc   : > { %v784_v38 = vadd.f32 %v3696_v25, %v698_v35  ;;  %v1025_v41 = vpop.f32.mrf.mxu2 }
  0xde   : > { %v870_v22 = vadd.f32 %v3692_v23, %v784_v38 }
  0xdf   : > { %v3698_v26 = vpop.f32.mrf.mxu0 }
  0xe0   : > { %v932_v49 = vpop.f32.mrf.mxu1 }
  0xe1   : > { %v954_v13 = vadd.f32 %v932_v49, %v868_v4  ;;  %v699_v49 = vadd.f32 %v3702_v28, %v606_v19 }
  0xe3   : > { %v3719_v31 = vpop.f32.mrf.mxu3  ;;  %v1041_v17 = vadd.f32 %v1019_v52, %v954_v13 }
  0xe4   : > { %v785_v23 = vadd.f32 %v3719_v31, %v699_v49  ;;  %v700_v31 = vadd.f32 %v3739_v36, %v609_v55 }
  0xe7   : > { %v3730_v33 = vpop.f32.mrf.mxu0 }
  0xe8   : > { %v935_v60 = vpop.f32.mrf.mxu1 }
  0xe9   : > { %v955_v20 = vadd.f32 %v935_v60, %v869_v29  ;;  %v871_v60 = vadd.f32 %v3698_v26, %v785_v23 }
  0xeb   : > { %v3746_v37 = vpop.f32.mrf.mxu3  ;;  %v1042_v44 = vadd.f32 %v1022_v12, %v955_v20  ;;  %v3184_v20 = vld [vmem:[%s4505_s6 + $0x1c] sm:$0xf] }
  0xec   : > { %v786_v26 = vadd.f32 %v3746_v37, %v700_v31  ;;  %3185 = vmatpush.msk.msra.mxu0 %vm504_vm0, %v3184_v20 }
  0xee   : > { %v872_v18 = vadd.f32 %v3730_v33, %v786_v26 }
  0xef   : > { %v3761_v42 = vpop.f32.mrf.mxu0 }
  0xf0   : > { %v938_v21 = vpop.f32.mrf.mxu1 }
  0xf1   : > { %v956_v3 = vadd.f32 %v938_v21, %v870_v22 }
  0xf3   : > { %v3777_v45 = vpop.f32.mrf.mxu3  ;;  %v1043_v58 = vadd.f32 %v1025_v41, %v956_v3 }
  0xf7   : > { %v3787_v48 = vpop.f32.mrf.mxu0 }
  0xf8   : > { %v941_v54 = vpop.f32.mrf.mxu1 }
  0xf9   : > { %v957_v7 = vadd.f32 %v941_v54, %v871_v60 }
  0xfb   : > { %v3802_v53 = vpop.f32.mrf.mxu3 }
  0xff   : > { %v1189_v57 = vpop.f32.mrf.mxu0 }
 0x100   : > { %v944_v13 = vpop.f32.mrf.mxu1 }
 0x103   : > { %v1103_v6 = vpop.f32.mrf.mxu3 }
 0x104   : > { %v1127_v10 = vadd.f32 %v1103_v6, %v1040_v2 }
 0x106   : > { %v1213_v62 = vadd.f32 %v1189_v57, %v1127_v10  ;;  %v1028_v57 = vpop.f32.mrf.mxu2 }
 0x107   : > { %v1192_v16 = vpop.f32.mrf.mxu0 }
 0x108   : > { %v1225_v15 = vadd.f32 %v3815_v8, %v1213_v62  ;;  %v612_v62 = vadd.f32 %v3634_v63, %v3618_v59  ;;  %v3164_v59 = vld [vmem:[%s4505_s6 + $0x14] sm:$0xf]  ;;  %v3174_v63 = vld [vmem:[%s4505_s6 + $0x18] sm:$0xf] }
 0x109   : > { %3165 = vmatpush.msk.msrb.mxu2 %vm504_vm0, %v3164_v59  ;;  %3175 = vmatpush.msk.msra.mxu3 %vm504_vm0, %v3174_v63 }
 0x10a   : > { %v1233_v30 = vmax.f32 %v1225_v15, 0.0  ;;  %v701_v29 = vadd.f32 %v3656_v5, %v612_v62  ;;  %v958_v5 = vadd.f32 %v944_v13, %v872_v18 }
 0x10b   : > { %v1106_v34 = vpop.f32.mrf.mxu3 }
 0x10c   : > { %1241 = vst.msk [vmem:[%s3827_s15] sm:$0xff] %vm479_vm1, %v1233_v30  ;;  %v1128_v0 = vadd.f32 %v1106_v34, %v1041_v17  ;;  %v787_v33 = vadd.f32 %v3777_v45, %v701_v29  ;;  %v947_v45 = vpop.f32.mrf.mxu1 }
 0x10d   : > { %1280 = vst.msk [vmem:[#allocation2 + $0x20] sm:$0xff] %vm479_vm1, %v1233_v30 }
 0x10e   : > { %v1214_v39 = vadd.f32 %v1192_v16, %v1128_v0  ;;  %v1044_v16 = vadd.f32 %v1028_v57, %v957_v7  ;;  %v1031_v17 = vpop.f32.mrf.mxu2  ;;  %v873_v19 = vadd.f32 %v3761_v42, %v787_v33  ;;  %v3194_v42 = vld [vmem:[%s4505_s6 + $0x20] sm:$0xf] }
 0x10f   : > { %v1195_v40 = vpop.f32.mrf.mxu0  ;;  %v1045_v41 = vadd.f32 %v1031_v17, %v958_v5  ;;  %3195 = vmatpush.msk.msra.mxu1 %vm504_vm0, %v3194_v42 }
 0x110   : > { %v1226_v43 = vadd.f32 %v3815_v8, %v1214_v39 }
 0x112   : > { %v1234_v46 = vmax.f32 %v1226_v43, 0.0 }
 0x113   : > { %v1109_v47 = vpop.f32.mrf.mxu3 }
 0x114   : > { %1242 = vst.msk [vmem:[%s3827_s15 + $0x8] sm:$0xff] %vm479_vm1, %v1234_v46  ;;  %v1129_v50 = vadd.f32 %v1109_v47, %v1042_v44  ;;  %v3842_v51 = vld [vmem:[#allocation2 + $0x20] sm:$0xff] }
 0x115   : > { %v1289_v25 = vld [vmem:[#allocation2 + $0x1f] sm:$0xff]  ;;  %1281 = vst.msk [vmem:[#allocation2 + $0x38] sm:$0xff] %vm479_vm1, %v1234_v46  ;;  %3118 = vmatmul.msk.f32.gmra.mxu1 %vm479_vm1, %v3842_v51 }
 0x116   : > { %v3844_v52 = vld [vmem:[#allocation2 + $0x21] sm:$0xff]  ;;  %3127 = vmatmul.msk.f32.gmra.mxu2 %vm479_vm1, %v1289_v25  ;;  %3146 = vmatmul.msk.f32.vlgmr.msrb.gmra.mxu0 %vm479_vm1, %v1289_v25  ;;  %v1215_v24 = vadd.f32 %v1195_v40, %v1129_v50  ;;  %v615_v40 = vadd.f32 %v3642_v1, %v3626_v61  ;;  %v1034_v25 = vpop.f32.mrf.mxu2  ;;  %v959_v61 = vadd.f32 %v947_v45, %v873_v19 }
 0x117   : > { %3137 = vmatmul.msk.f32.gmra.mxu3 %vm479_vm1, %v3844_v52  ;;  %v1198_v28 = vpop.f32.mrf.mxu0 }
 0x118   : > { %v1227_v56 = vadd.f32 %v3815_v8, %v1215_v24  ;;  %v702_v22 = vadd.f32 %v3666_v11, %v615_v40  ;;  %v1046_v23 = vadd.f32 %v1034_v25, %v959_v61 }
 0x11a   : > { %v1235_v2 = vmax.f32 %v1227_v56, 0.0  ;;  %v788_v1 = vadd.f32 %v3802_v53, %v702_v22  ;;  %v1967_v22 = vld [vmem:[#allocation2 + $0xe1] sm:$0xff] }
 0x11b   : > { %v1112_v4 = vpop.f32.mrf.mxu3 }
 0x11c   : > { %1243 = vst.msk [vmem:[%s3827_s15 + $0x10] sm:$0xff] %vm479_vm1, %v1235_v2  ;;  %v1130_v6 = vadd.f32 %v1112_v4, %v1043_v58  ;;  %v3861_v9 = vld [vmem:[#allocation2 + $0x38] sm:$0xff]  ;;  %v874_v24 = vadd.f32 %v3787_v48, %v788_v1 }
 0x11d   : > { %v3863_v10 = vld [vmem:[#allocation2 + $0x37] sm:$0xff]  ;;  %1282 = vst.msk [vmem:[#allocation2 + $0x50] sm:$0xff] %vm479_vm1, %v1235_v2  ;;  %3119 = vmatmul.msk.f32.gmra.mxu1 %vm479_vm1, %v3861_v9 }
 0x11e   : > { %v3865_v12 = vld [vmem:[#allocation2 + $0x39] sm:$0xff]  ;;  %3128 = vmatmul.msk.f32.gmra.mxu2 %vm479_vm1, %v3863_v10  ;;  %3147 = vmatmul.msk.f32.gmra.mxu0 %vm479_vm1, %v3863_v10  ;;  %v1216_v32 = vadd.f32 %v1198_v28, %v1130_v6  ;;  %v950_v28 = vpop.f32.mrf.mxu1  ;;  %v1037_v4 = vpop.f32.mrf.mxu2 }
 0x11f   : > { %3138 = vmatmul.msk.f32.gmra.mxu3 %vm479_vm1, %v3865_v12  ;;  %v1201_v36 = vpop.f32.mrf.mxu0  ;;  %v960_v2 = vadd.f32 %v950_v28, %v874_v24 }
 0x120   : > { %v1228_v14 = vadd.f32 %v3815_v8, %v1216_v32 }
 0x121   : > { %v1047_v6 = vadd.f32 %v1037_v4, %v960_v2  ;;  %v2115_v4 = vld [vmem:[#allocation3 + $0x8] sm:$0xff] }
 0x122   : > { %v1236_v15 = vmax.f32 %v1228_v14, 0.0 }
 0x123   : > { %v1115_v37 = vpop.f32.mrf.mxu3 }
 0x124   : > { %1244 = vst.msk [vmem:[%s3827_s15 + $0x18] sm:$0xff] %vm479_vm1, %v1236_v15  ;;  %v1131_v30 = vadd.f32 %v1115_v37, %v1044_v16  ;;  %v3884_v21 = vld [vmem:[#allocation2 + $0x50] sm:$0xff] }
 0x125   : > { %v3886_v34 = vld [vmem:[#allocation2 + $0x4f] sm:$0xff]  ;;  %1283 = vst.msk [vmem:[#allocation2 + $0x68] sm:$0xff] %vm479_vm1, %v1236_v15  ;;  %3120 = vmatmul.msk.f32.gmra.mxu1 %vm479_vm1, %v3884_v21 }
 0x126   : > { %v3888_v35 = vld [vmem:[#allocation2 + $0x51] sm:$0xff]  ;;  %3129 = vmatmul.msk.f32.gmra.mxu2 %vm479_vm1, %v3886_v34  ;;  %3148 = vmatmul.msk.f32.gmra.mxu0 %vm479_vm1, %v3886_v34  ;;  %v1217_v0 = vadd.f32 %v1201_v36, %v1131_v30 }
 0x127   : > { %3139 = vmatmul.msk.f32.gmra.mxu3 %vm479_vm1, %v3888_v35  ;;  %v1204_v38 = vpop.f32.mrf.mxu0 }
 0x128   : > { %v1229_v39 = vadd.f32 %v3815_v8, %v1217_v0 }
 0x12a   : > { %v1237_v43 = vmax.f32 %v1229_v39, 0.0  ;;  %v3204_v39 = vld [vmem:[%s4507_s8 + $0x8] sm:$0xff] }
 0x12b   : > { %v1118_v44 = vpop.f32.mrf.mxu3  ;;  %2164 = vmatpush.msra.mxu2 %v3204_v39  ;;  %v4211_v39 = vld [vmem:[%s4506_s7] ss:$0 sm:$0xff] }
 0x12c   : > { %1245 = vst.msk [vmem:[%s3827_s15 + $0x20] sm:$0xff] %vm479_vm1, %v1237_v43  ;;  %v1132_v46 = vadd.f32 %v1118_v44, %v1045_v41  ;;  %v3919_v47 = vld [vmem:[#allocation2 + $0x68] sm:$0xff] }
 0x12d   : > { %v3921_v49 = vld [vmem:[#allocation2 + $0x67] sm:$0xff]  ;;  %1284 = vst.msk [vmem:[#allocation2 + $0x80] sm:$0xff] %vm479_vm1, %v1237_v43  ;;  %3121 = vmatmul.msk.f32.gmra.mxu1 %vm479_vm1, %v3919_v47 }
 0x12e   : > { %v3923_v50 = vld [vmem:[#allocation2 + $0x69] sm:$0xff]  ;;  %3130 = vmatmul.msk.f32.gmra.mxu2 %vm479_vm1, %v3921_v49  ;;  %3149 = vmatmul.msk.f32.gmra.mxu0 %vm479_vm1, %v3921_v49  ;;  %v1218_v11 = vadd.f32 %v1204_v38, %v1132_v46 }
 0x12f   : > { %3140 = vmatmul.msk.f32.gmra.mxu3 %vm479_vm1, %v3923_v50  ;;  %v1207_v3 = vpop.f32.mrf.mxu0 }
 0x130   : > { %v1230_v54 = vadd.f32 %v3815_v8, %v1218_v11 }
 0x132   : > { %v1238_v53 = vmax.f32 %v1230_v54, 0.0 }
 0x133   : > { %v1121_v55 = vpop.f32.mrf.mxu3 }
 0x134   : > { %1246 = vst.msk [vmem:[%s3827_s15 + $0x28] sm:$0xff] %vm479_vm1, %v1238_v53  ;;  %v1133_v56 = vadd.f32 %v1121_v55, %v1046_v23  ;;  %v1302_v57 = vld [vmem:[#allocation2 + $0x80] sm:$0xff] }
 0x135   : > { %v1293_v58 = vld [vmem:[#allocation2 + $0x7f] sm:$0xff]  ;;  %1285 = vst.msk [vmem:[#allocation2 + $0x98] sm:$0xff] %vm479_vm1, %v1238_v53  ;;  %3122 = vmatmul.msk.f32.gmra.mxu1 %vm479_vm1, %v1302_v57 }
 0x136   : > { %v3943_v60 = vld [vmem:[#allocation2 + $0x81] sm:$0xff]  ;;  %3131 = vmatmul.msk.f32.gmra.mxu2 %vm479_vm1, %v1293_v58  ;;  %3150 = vmatmul.msk.f32.gmra.mxu0 %vm479_vm1, %v1293_v58  ;;  %v1219_v48 = vadd.f32 %v1207_v3, %v1133_v56 }
 0x137   : > { %3141 = vmatmul.msk.f32.gmra.mxu3 %vm479_vm1, %v3943_v60  ;;  %v1210_v32 = vpop.f32.mrf.mxu0  ;;  %v4035_v59 = vpop.f32.mrf.mxu2 }
 0x138   : > { %v1231_v31 = vadd.f32 %v3815_v8, %v1219_v48  ;;  %v3221_v48 = vld [vmem:[%s4507_s8 + $0x10] sm:$0xff] }
 0x139   : > { %2304 = vmatpush.msrb.mxu0 %v3221_v48 }
 0x13a   : > { %v1239_v7 = vmax.f32 %v1231_v31, 0.0  ;;  %v2106_v31 = vld [vmem:[#allocation3 + $0x7] sm:$0xff] }
 0x13b   : > { %v1124_v26 = vpop.f32.mrf.mxu3 }
 0x13c   : > { %1247 = vst.msk [vmem:[%s3827_s15 + $0x30] sm:$0xff] %vm479_vm1, %v1239_v7  ;;  %v1134_v36 = vadd.f32 %v1124_v26, %v1047_v6  ;;  %v1303_v13 = vld [vmem:[#allocation2 + $0x98] sm:$0xff]  ;;  %v3239_v6 = vld [vmem:[%s4507_s8 + $0x20] sm:$0xff] }
 0x13d   : > { %v1294_v14 = vld [vmem:[#allocation2 + $0x97] sm:$0xff]  ;;  %1286 = vst.msk [vmem:[#allocation2 + $0xb0] sm:$0xff] %vm479_vm1, %v1239_v7  ;;  %3123 = vmatmul.msk.f32.gmra.mxu1 %vm479_vm1, %v1303_v13 }
 0x13e   : > { %v3954_v62 = vld [vmem:[#allocation2 + $0x99] sm:$0xff]  ;;  %3132 = vmatmul.msk.f32.gmra.mxu2 %vm479_vm1, %v1294_v14  ;;  %3151 = vmatmul.msk.f32.gmra.mxu0 %vm479_vm1, %v1294_v14  ;;  %v1220_v16 = vadd.f32 %v1210_v32, %v1134_v36 }
 0x13f   : > { %3142 = vmatmul.msk.f32.gmra.mxu3 %vm479_vm1, %v3954_v62  ;;  %v2255_v26 = vld [vmem:[#allocation3 + $0x9] sm:$0xff] }
 0x140   : > { %v1232_v18 = vadd.f32 %v3815_v8, %v1220_v16  ;;  %v1795_v8 = vld [vmem:[#allocation2 + $0xdf] sm:$0xff] }
 0x142   : > { %v1240_v15 = vmax.f32 %v1232_v18, 0.0 }
 0x144   : > { %1248 = vst.msk [vmem:[%s3827_s15 + $0x38] sm:$0xff] %vm479_vm1, %v1240_v15  ;;  %v1304_v17 = vld [vmem:[#allocation2 + $0xb0] sm:$0xff] }
 0x145   : > { %v1295_v37 = vld [vmem:[#allocation2 + $0xaf] sm:$0xff]  ;;  %1287 = vst.msk [vmem:[#allocation2 + $0xc8] sm:$0xff] %vm479_vm1, %v1240_v15  ;;  %3124 = vmatmul.msk.f32.gmra.mxu1 %vm479_vm1, %v1304_v17 }
 0x146   : > { %v3965_v29 = vld [vmem:[#allocation2 + $0xb1] sm:$0xff]  ;;  %3133 = vmatmul.msk.f32.gmra.mxu2 %vm479_vm1, %v1295_v37  ;;  %3152 = vmatmul.msk.f32.gmra.mxu0 %vm479_vm1, %v1295_v37 }
 0x147   : > { %3143 = vmatmul.msk.f32.gmra.mxu3 %vm479_vm1, %v3965_v29 }
 0x14c   : > { %v1536_v30 = vld [vmem:[#allocation2 + $0xc7] sm:$0xff] }
 0x14d   : > { %3156 = vmatmul.msk.f32.vlgmr.msrb.gmra.mxu1 %vm479_vm1, %v3842_v51  ;;  %v1622_v51 = vld [vmem:[#allocation2 + $0xc8] sm:$0xff] }
 0x14e   : > { %3166 = vmatmul.msk.f32.vlgmr.msrb.gmra.mxu2 %vm479_vm1, %v3844_v52  ;;  %3153 = vmatmul.msk.f32.gmra.mxu0 %vm479_vm1, %v1536_v30  ;;  %v1708_v52 = vld [vmem:[#allocation2 + $0xc9] sm:$0xff] }
 0x14f   : > { %3176 = vmatmul.msk.f32.vlgmr.msra.gmra.mxu3 %vm479_vm1, %v3863_v10  ;;  %v1881_v10 = vld [vmem:[#allocation2 + $0xe0] sm:$0xff]  ;;  %2470 = vmatpush.msrb.mxu2 %v3239_v6 }
 0x155   : > { %3157 = vmatmul.msk.f32.gmra.mxu1 %vm479_vm1, %v3861_v9 }
 0x156   : > { %3167 = vmatmul.msk.f32.gmra.mxu2 %vm479_vm1, %v3865_v12  ;;  %3186 = vmatmul.msk.f32.vlgmr.msra.gmra.mxu0 %vm479_vm1, %v3861_v9  ;;  %v4022_v9 = vpop.f32.mrf.mxu1 }
 0x157   : > { %3177 = vmatmul.msk.f32.gmra.mxu3 %vm479_vm1, %v3886_v34  ;;  %v1420_v36 = vadd.f32 %v4035_v59, %v4022_v9 }
 0x15d   : > { %3158 = vmatmul.msk.f32.gmra.mxu1 %vm479_vm1, %v3884_v21 }
 0x15e   : > { %3168 = vmatmul.msk.f32.gmra.mxu2 %vm479_vm1, %v3888_v35  ;;  %3187 = vmatmul.msk.f32.gmra.mxu0 %vm479_vm1, %v3884_v21 }
 0x15f   : > { %3178 = vmatmul.msk.f32.gmra.mxu3 %vm479_vm1, %v3921_v49 }
 0x165   : > { %3159 = vmatmul.msk.f32.gmra.mxu1 %vm479_vm1, %v3919_v47 }
 0x166   : > { %3169 = vmatmul.msk.f32.gmra.mxu2 %vm479_vm1, %v3923_v50  ;;  %3188 = vmatmul.msk.f32.gmra.mxu0 %vm479_vm1, %v3919_v47 }
 0x167   : > { %3179 = vmatmul.msk.f32.gmra.mxu3 %vm479_vm1, %v1293_v58  ;;  %v2114_v58 = vld [vmem:[%s4507_s8] sm:$0xff] }
 0x168   : > { %2229 = vmatpush.msrb.mxu3 %v2114_v58 }
 0x16d   : > { %3160 = vmatmul.msk.f32.gmra.mxu1 %vm479_vm1, %v1302_v57 }
 0x16e   : > { %3170 = vmatmul.msk.f32.gmra.mxu2 %vm479_vm1, %v3943_v60  ;;  %3189 = vmatmul.msk.f32.gmra.mxu0 %vm479_vm1, %v1302_v57 }
 0x16f   : > { %3180 = vmatmul.msk.f32.gmra.mxu3 %vm479_vm1, %v1294_v14 }
 0x175   : > { %3161 = vmatmul.msk.f32.gmra.mxu1 %vm479_vm1, %v1303_v13 }
 0x176   : > { %3171 = vmatmul.msk.f32.gmra.mxu2 %vm479_vm1, %v3954_v62  ;;  %3190 = vmatmul.msk.f32.gmra.mxu0 %vm479_vm1, %v1303_v13  ;;  %v3230_v13 = vld [vmem:[%s4507_s8 + $0x18] sm:$0xff] }
 0x177   : > { %3181 = vmatmul.msk.f32.gmra.mxu3 %vm479_vm1, %v1295_v37  ;;  %2387 = vmatpush.msrb.mxu1 %v3230_v13 }
 0x17d   : > { %3162 = vmatmul.msk.f32.gmra.mxu1 %vm479_vm1, %v1304_v17 }
 0x17e   : > { %3172 = vmatmul.msk.f32.gmra.mxu2 %vm479_vm1, %v3965_v29  ;;  %3191 = vmatmul.msk.f32.gmra.mxu0 %vm479_vm1, %v1304_v17 }
 0x17f   : > { %3182 = vmatmul.msk.f32.gmra.mxu3 %vm479_vm1, %v1536_v30 }
 0x185   : > { %3163 = vmatmul.msk.f32.gmra.mxu1 %vm479_vm1, %v1622_v51 }
 0x186   : > { %3173 = vmatmul.msk.f32.gmra.mxu2 %vm479_vm1, %v1708_v52  ;;  %3192 = vmatmul.msk.f32.gmra.mxu0 %vm479_vm1, %v1622_v51 }
 0x187   : > { %3183 = vmatmul.msk.f32.gmra.mxu3 %vm479_vm1, %v1795_v8 }
 0x18d   : > { %3196 = vmatmul.msk.f32.vlgmr.msra.gmra.mxu1 %vm479_vm1, %v3865_v12  ;;  %v4041_v12 = vpop.f32.mrf.mxu3 }
 0x18e   : > { %3193 = vmatmul.msk.f32.gmra.mxu0 %vm479_vm1, %v1881_v10  ;;  %3205 = vmatmul.msk.f32.vlgmr.msra.gmra.mxu2 %vm2066_vm2, %v2115_v4  ;;  %v1521_v18 = vadd.f32 %v4041_v12, %v1420_v36 }
 0x18f   : > { %3213 = vmatmul.msk.f32.vlgmr.msrb.gmra.mxu3 %vm2066_vm2, %v2106_v31 }
 0x192   : > { %v4027_v21 = vpop.f32.mrf.mxu1 }
 0x193   : > { %v4043_v5 = vpop.f32.mrf.mxu0 }
 0x194   : > { %v1607_v15 = vadd.f32 %v4043_v5, %v1521_v18 }
 0x195   : > { %3197 = vmatmul.msk.f32.gmra.mxu1 %vm479_vm1, %v3888_v35 }
 0x196   : > { %3222 = vmatmul.msk.f32.vlgmr.msrb.gmra.mxu0 %vm2066_vm2, %v2255_v26 }
 0x199   : > { %v4045_v33 = vpop.f32.mrf.mxu2 }
 0x19a   : > { %v4031_v34 = vpop.f32.mrf.mxu1  ;;  %v4051_v35 = vpop.f32.mrf.mxu3  ;;  %v1423_v17 = vadd.f32 %v4045_v33, %v4027_v21 }
 0x19b   : > { %v4055_v38 = vpop.f32.mrf.mxu0 }
 0x19c   : > { %v1522_v30 = vadd.f32 %v4051_v35, %v1423_v17 }
 0x19d   : > { %3198 = vmatmul.msk.f32.gmra.mxu1 %vm479_vm1, %v3923_v50 }
 0x19e   : > { %v1608_v10 = vadd.f32 %v4055_v38, %v1522_v30 }
 0x1a1   : > { %v4060_v45 = vpop.f32.mrf.mxu2 }
 0x1a2   : > { %v4037_v63 = vpop.f32.mrf.mxu1  ;;  %v4064_v40 = vpop.f32.mrf.mxu3  ;;  %v1426_v21 = vadd.f32 %v4060_v45, %v4031_v34 }
 0x1a3   : > { %v4068_v19 = vpop.f32.mrf.mxu0 }
 0x1a4   : > { %v1523_v5 = vadd.f32 %v4064_v40, %v1426_v21 }
 0x1a5   : > { %3199 = vmatmul.msk.f32.gmra.mxu1 %vm479_vm1, %v3943_v60 }
 0x1a6   : > { %v1609_v34 = vadd.f32 %v4068_v19, %v1523_v5 }
 0x1a9   : > { %v4071_v43 = vpop.f32.mrf.mxu2 }
 0x1aa   : > { %v4047_v0 = vpop.f32.mrf.mxu1  ;;  %v4075_v46 = vpop.f32.mrf.mxu3  ;;  %v1429_v45 = vadd.f32 %v4071_v43, %v4037_v63 }
 0x1ab   : > { %v4078_v47 = vpop.f32.mrf.mxu0 }
 0x1ac   : > { %v1524_v4 = vadd.f32 %v4075_v46, %v1429_v45 }
 0x1ad   : > { %3200 = vmatmul.msk.f32.gmra.mxu1 %vm479_vm1, %v3954_v62 }
 0x1ae   : > { %v1610_v36 = vadd.f32 %v4078_v47, %v1524_v4 }
 0x1b1   : > { %v4080_v49 = vpop.f32.mrf.mxu2 }
 0x1b2   : > { %v4053_v20 = vpop.f32.mrf.mxu1  ;;  %v4084_v25 = vpop.f32.mrf.mxu3  ;;  %v1432_v63 = vadd.f32 %v4080_v49, %v4047_v0 }
 0x1b3   : > { %v4086_v61 = vpop.f32.mrf.mxu0 }
 0x1b5   : > { %3201 = vmatmul.msk.f32.gmra.mxu1 %vm479_vm1, %v3965_v29 }
 0x1b9   : > { %v4088_v1 = vpop.f32.mrf.mxu2 }
 0x1ba   : > { %v4066_v41 = vpop.f32.mrf.mxu1  ;;  %v4092_v42 = vpop.f32.mrf.mxu3 }
 0x1bb   : > { %v4096_v3 = vpop.f32.mrf.mxu0 }
 0x1bd   : > { %3202 = vmatmul.msk.f32.gmra.mxu1 %vm479_vm1, %v1708_v52 }
 0x1c1   : > { %v4098_v23 = vpop.f32.mrf.mxu2 }
 0x1c2   : > { %v4073_v44 = vpop.f32.mrf.mxu1  ;;  %v4100_v24 = vpop.f32.mrf.mxu3 }
 0x1c3   : > { %v4104_v28 = vpop.f32.mrf.mxu0 }
 0x1c5   : > { %3203 = vmatmul.msk.f32.gmra.mxu1 %vm479_vm1, %v1967_v22 }
 0x1c9   : > { %v4106_v55 = vpop.f32.mrf.mxu2 }
 0x1ca   : > { %v4082_v50 = vpop.f32.mrf.mxu1  ;;  %v4118_v57 = vpop.f32.mrf.mxu3 }
 0x1cb   : > { %v4129_v60 = vpop.f32.mrf.mxu0  ;;  %v1693_v37 = vadd.f32 %v4082_v50, %v1607_v15 }
 0x1d1   : > { %v1755_v2 = vpop.f32.mrf.mxu2 }
 0x1d2   : > { %v4090_v11 = vpop.f32.mrf.mxu1  ;;  %v1842_v32 = vpop.f32.mrf.mxu3  ;;  %v1779_v8 = vadd.f32 %v1755_v2, %v1693_v37  ;;  %v1525_v37 = vadd.f32 %v4084_v25, %v1432_v63  ;;  %v1435_v25 = vadd.f32 %v4088_v1, %v4053_v20 }
 0x1d3   : > { %v1928_v14 = vpop.f32.mrf.mxu0  ;;  %v1694_v12 = vadd.f32 %v4090_v11, %v1608_v10 }
 0x1d4   : > { %v1866_v59 = vadd.f32 %v1842_v32, %v1779_v8  ;;  %v1526_v5 = vadd.f32 %v4092_v42, %v1435_v25 }
 0x1d6   : > { %v1952_v33 = vadd.f32 %v1928_v14, %v1866_v59 }
 0x1d9   : > { %v1758_v62 = vpop.f32.mrf.mxu2 }
 0x1da   : > { %v4094_v54 = vpop.f32.mrf.mxu1  ;;  %v1845_v29 = vpop.f32.mrf.mxu3  ;;  %v1780_v35 = vadd.f32 %v1758_v62, %v1694_v12 }
 0x1db   : > { %v1931_v52 = vpop.f32.mrf.mxu0  ;;  %v1695_v2 = vadd.f32 %v4094_v54, %v1609_v34 }
 0x1dc   : > { %v1867_v27 = vadd.f32 %v1845_v29, %v1780_v35 }
 0x1de   : > { %v1953_v31 = vadd.f32 %v1931_v52, %v1867_v27 }
 0x1e1   : > { %v1761_v9 = vpop.f32.mrf.mxu2 }
 0x1e2   : > { %v4102_v53 = vpop.f32.mrf.mxu1  ;;  %v1848_v22 = vpop.f32.mrf.mxu3  ;;  %v1781_v6 = vadd.f32 %v1761_v9, %v1695_v2 }
 0x1e3   : > { %v1934_v58 = vpop.f32.mrf.mxu0  ;;  %v1696_v54 = vadd.f32 %v4102_v53, %v1610_v36  ;;  %v1611_v53 = vadd.f32 %v4086_v61, %v1525_v37 }
 0x1e4   : > { %v1868_v43 = vadd.f32 %v1848_v22, %v1781_v6  ;;  %v1438_v22 = vadd.f32 %v4098_v23, %v4066_v41  ;;  %v3248_v23 = vld [vmem:[%s4507_s8 + $0x28] sm:$0xff] }
 0x1e5   : > { %2553 = vmatpush.msra.mxu3 %v3248_v23 }
 0x1e6   : > { %v1954_v29 = vadd.f32 %v1934_v58, %v1868_v43  ;;  %v1527_v2 = vadd.f32 %v4100_v24, %v1438_v22  ;;  %v3257_v24 = vld [vmem:[%s4507_s8 + $0x30] sm:$0xff] }
 0x1e7   : > { %2637 = vmatpush.msra.mxu0 %v3257_v24 }
 0x1e8   : > { %v1613_v6 = vadd.f32 %v4104_v28, %v1527_v2 }
 0x1e9   : > { %v1764_v40 = vpop.f32.mrf.mxu2 }
 0x1ea   : > { %v4112_v56 = vpop.f32.mrf.mxu1  ;;  %v1851_v19 = vpop.f32.mrf.mxu3  ;;  %v1782_v47 = vadd.f32 %v1764_v40, %v1696_v54 }
 0x1eb   : > { %v1937_v14 = vpop.f32.mrf.mxu0  ;;  %v1697_v9 = vadd.f32 %v4112_v56, %v1611_v53  ;;  %v1612_v56 = vadd.f32 %v4096_v3, %v1526_v5 }
 0x1ec   : > { %v1869_v30 = vadd.f32 %v1851_v19, %v1782_v47 }
 0x1f1   : > { %v1767_v46 = vpop.f32.mrf.mxu2 }
 0x1f2   : > { %v4143_v7 = vpop.f32.mrf.mxu1  ;;  %v1854_v52 = vpop.f32.mrf.mxu3  ;;  %v1783_v61 = vadd.f32 %v1767_v46, %v1697_v9 }
 0x1f3   : > { %v1940_v35 = vpop.f32.mrf.mxu0  ;;  %v1698_v34 = vadd.f32 %v4143_v7, %v1612_v56 }
 0x1f9   : > { %v1770_v20 = vpop.f32.mrf.mxu2 }
 0x1fa   : > { %v4169_v16 = vpop.f32.mrf.mxu1  ;;  %v1857_v27 = vpop.f32.mrf.mxu3  ;;  %v1784_v3 = vadd.f32 %v1770_v20, %v1698_v34 }
 0x1fb   : > { %v1943_v4 = vpop.f32.mrf.mxu0  ;;  %v1699_v36 = vadd.f32 %v4169_v16, %v1613_v6 }
 0x202   : > { %v4193_v51 = vpop.f32.mrf.mxu1 }
 0x203   : > { %v1946_v47 = vpop.f32.mrf.mxu0 }
 0x20a   : > { %v2014_v38 = vpop.f32.mrf.mxu1 }
 0x20b   : > { %v2038_v50 = vadd.f32 %v2014_v38, %v1952_v33  ;;  %v1955_v33 = vadd.f32 %v1937_v14, %v1869_v30  ;;  %v1870_v38 = vadd.f32 %v1854_v52, %v1783_v61  ;;  %v1949_v61 = vpop.f32.mrf.mxu0 }
 0x20d   : > { %v2050_v11 = vadd.f32 %v4211_v39, %v2038_v50 }
 0x20f   : > { %v2058_v48 = vmax.f32 %v2050_v11, 0.0 }
 0x211   : > { %2098 = vst.msk [vmem:[#allocation3 + $0x20] sm:$0xff] %vm2066_vm2, %v2058_v48  ;;  %v1956_v48 = vadd.f32 %v1940_v35, %v1870_v38 }
 0x212   : > { %v2017_v26 = vpop.f32.mrf.mxu1 }
 0x213   : > { %v2039_v32 = vadd.f32 %v2017_v26, %v1953_v31  ;;  %v1773_v31 = vpop.f32.mrf.mxu2  ;;  %v1441_v26 = vadd.f32 %v4106_v55, %v4073_v44  ;;  %v1860_v44 = vpop.f32.mrf.mxu3  ;;  %v3275_v55 = vld [vmem:[%s4507_s8 + $0x40] sm:$0xff] }
 0x214   : > { %v1785_v46 = vadd.f32 %v1773_v31, %v1699_v36  ;;  %2803 = vmatpush.msra.mxu2 %v3275_v55  ;;  %v2306_v23 = vpop.f32.mrf.mxu0 }
 0x215   : > { %v2051_v13 = vadd.f32 %v4211_v39, %v2039_v32  ;;  %v1871_v32 = vadd.f32 %v1857_v27, %v1784_v3  ;;  %v1528_v14 = vadd.f32 %v4118_v57, %v1441_v26  ;;  %v3266_v57 = vld [vmem:[%s4507_s8 + $0x38] sm:$0xff] }
 0x216   : > { %2720 = vmatpush.msra.mxu1 %v3266_v57  ;;  %v1872_v37 = vadd.f32 %v1860_v44, %v1785_v46 }
 0x217   : > { %v2059_v62 = vmax.f32 %v2051_v13, 0.0 }
 0x218   : > { %v4225_v18 = vld [vmem:[#allocation3 + $0x20] sm:$0xff]  ;;  %v1958_v52 = vadd.f32 %v1946_v47, %v1872_v37 }
 0x219   : > { %v2107_v15 = vld [vmem:[#allocation3 + $0x1f] sm:$0xff]  ;;  %2099 = vst.msk [vmem:[#allocation3 + $0x38] sm:$0xff] %vm2066_vm2, %v2059_v62  ;;  %3206 = vmatmul.msk.f32.gmra.mxu2 %vm2066_vm2, %v4225_v18  ;;  %v1957_v62 = vadd.f32 %v1943_v4, %v1871_v32 }
 0x21a   : > { %v4227_v17 = vld [vmem:[#allocation3 + $0x21] sm:$0xff]  ;;  %3214 = vmatmul.msk.f32.gmra.mxu3 %vm2066_vm2, %v2107_v15  ;;  %3231 = vmatmul.msk.f32.vlgmr.msrb.gmra.mxu1 %vm2066_vm2, %v2107_v15  ;;  %v2020_v0 = vpop.f32.mrf.mxu1  ;;  %v1614_v15 = vadd.f32 %v4129_v60, %v1528_v14 }
 0x21b   : > { %3223 = vmatmul.msk.f32.gmra.mxu0 %vm2066_vm2, %v4227_v17  ;;  %v2040_v49 = vadd.f32 %v2020_v0, %v1954_v29  ;;  %v1776_v0 = vpop.f32.mrf.mxu2  ;;  %v1863_v60 = vpop.f32.mrf.mxu3 }
 0x21d   : > { %v2052_v8 = vadd.f32 %v4211_v39, %v2040_v49  ;;  %v1700_v49 = vadd.f32 %v4193_v51, %v1614_v15 }
 0x21f   : > { %v2060_v10 = vmax.f32 %v2052_v8, 0.0  ;;  %v1786_v9 = vadd.f32 %v1776_v0, %v1700_v49 }
 0x220   : > { %v4242_v21 = vld [vmem:[#allocation3 + $0x38] sm:$0xff] }
 0x221   : > { %v4244_v59 = vld [vmem:[#allocation3 + $0x37] sm:$0xff]  ;;  %2100 = vst.msk [vmem:[#allocation3 + $0x50] sm:$0xff] %vm2066_vm2, %v2060_v10  ;;  %3207 = vmatmul.msk.f32.gmra.mxu2 %vm2066_vm2, %v4242_v21  ;;  %v1873_v5 = vadd.f32 %v1863_v60, %v1786_v9 }
 0x222   : > { %v4246_v12 = vld [vmem:[#allocation3 + $0x39] sm:$0xff]  ;;  %3215 = vmatmul.msk.f32.gmra.mxu3 %vm2066_vm2, %v4244_v59  ;;  %3232 = vmatmul.msk.f32.gmra.mxu1 %vm2066_vm2, %v4244_v59  ;;  %v2023_v1 = vpop.f32.mrf.mxu1 }
 0x223   : > { %3224 = vmatmul.msk.f32.gmra.mxu0 %vm2066_vm2, %v4246_v12  ;;  %v2041_v42 = vadd.f32 %v2023_v1, %v1955_v33  ;;  %v1959_v56 = vadd.f32 %v1949_v61, %v1873_v5 }
 0x225   : > { %v2053_v50 = vadd.f32 %v4211_v39, %v2041_v42 }
 0x227   : > { %v2061_v45 = vmax.f32 %v2053_v50, 0.0 }
 0x228   : > { %v4263_v58 = vld [vmem:[#allocation3 + $0x50] sm:$0xff] }
 0x229   : > { %v4265_v11 = vld [vmem:[#allocation3 + $0x4f] sm:$0xff]  ;;  %2101 = vst.msk [vmem:[#allocation3 + $0x68] sm:$0xff] %vm2066_vm2, %v2061_v45  ;;  %3208 = vmatmul.msk.f32.gmra.mxu2 %vm2066_vm2, %v4263_v58 }
 0x22a   : > { %v4267_v40 = vld [vmem:[#allocation3 + $0x51] sm:$0xff]  ;;  %3216 = vmatmul.msk.f32.gmra.mxu3 %vm2066_vm2, %v4265_v11  ;;  %3233 = vmatmul.msk.f32.gmra.mxu1 %vm2066_vm2, %v4265_v11  ;;  %v2026_v41 = vpop.f32.mrf.mxu1 }
 0x22b   : > { %3225 = vmatmul.msk.f32.gmra.mxu0 %vm2066_vm2, %v4267_v40  ;;  %v2042_v7 = vadd.f32 %v2026_v41, %v1956_v48  ;;  %v2231_v41 = vpop.f32.mrf.mxu3 }
 0x22d   : > { %v2054_v19 = vadd.f32 %v4211_v39, %v2042_v7 }
 0x22f   : > { %v2062_v63 = vmax.f32 %v2054_v19, 0.0  ;;  %v2761_v19 = vld [vmem:[#allocation3 + $0xe1] sm:$0xff] }
 0x230   : > { %v4290_v43 = vld [vmem:[#allocation3 + $0x68] sm:$0xff] }
 0x231   : > { %v4292_v13 = vld [vmem:[#allocation3 + $0x67] sm:$0xff]  ;;  %2102 = vst.msk [vmem:[#allocation3 + $0x80] sm:$0xff] %vm2066_vm2, %v2062_v63  ;;  %3209 = vmatmul.msk.f32.gmra.mxu2 %vm2066_vm2, %v4290_v43 }
 0x232   : > { %v4294_v54 = vld [vmem:[#allocation3 + $0x69] sm:$0xff]  ;;  %3217 = vmatmul.msk.f32.gmra.mxu3 %vm2066_vm2, %v4292_v13  ;;  %3234 = vmatmul.msk.f32.gmra.mxu1 %vm2066_vm2, %v4292_v13  ;;  %v2029_v28 = vpop.f32.mrf.mxu1 }
 0x233   : > { %3226 = vmatmul.msk.f32.gmra.mxu0 %vm2066_vm2, %v4294_v54  ;;  %v2043_v16 = vadd.f32 %v2029_v28, %v1957_v62 }
 0x235   : > { %v2055_v29 = vadd.f32 %v4211_v39, %v2043_v16 }
 0x237   : > { %v2063_v53 = vmax.f32 %v2055_v29, 0.0 }
 0x238   : > { %v2120_v25 = vld [vmem:[#allocation3 + $0x80] sm:$0xff] }
 0x239   : > { %v2111_v30 = vld [vmem:[#allocation3 + $0x7f] sm:$0xff]  ;;  %2103 = vst.msk [vmem:[#allocation3 + $0x98] sm:$0xff] %vm2066_vm2, %v2063_v53  ;;  %3210 = vmatmul.msk.f32.gmra.mxu2 %vm2066_vm2, %v2120_v25 }
 0x23a   : > { %v4315_v8 = vld [vmem:[#allocation3 + $0x81] sm:$0xff]  ;;  %3218 = vmatmul.msk.f32.gmra.mxu3 %vm2066_vm2, %v2111_v30  ;;  %3235 = vmatmul.msk.f32.gmra.mxu1 %vm2066_vm2, %v2111_v30  ;;  %v2032_v51 = vpop.f32.mrf.mxu1 }
 0x23b   : > { %3227 = vmatmul.msk.f32.gmra.mxu0 %vm2066_vm2, %v4315_v8  ;;  %v2044_v10 = vadd.f32 %v2032_v51, %v1958_v52 }
 0x23d   : > { %v2056_v33 = vadd.f32 %v4211_v39, %v2044_v10 }
 0x23f   : > { %v2064_v35 = vmax.f32 %v2056_v33, 0.0 }
 0x240   : > { %v2121_v20 = vld [vmem:[#allocation3 + $0x98] sm:$0xff] }
 0x241   : > { %v2112_v1 = vld [vmem:[#allocation3 + $0x97] sm:$0xff]  ;;  %2104 = vst.msk [vmem:[#allocation3 + $0xb0] sm:$0xff] %vm2066_vm2, %v2064_v35  ;;  %3211 = vmatmul.msk.f32.gmra.mxu2 %vm2066_vm2, %v2121_v20 }
 0x242   : > { %v4324_v42 = vld [vmem:[#allocation3 + $0x99] sm:$0xff]  ;;  %3219 = vmatmul.msk.f32.gmra.mxu3 %vm2066_vm2, %v2112_v1  ;;  %3236 = vmatmul.msk.f32.gmra.mxu1 %vm2066_vm2, %v2112_v1  ;;  %v2035_v22 = vpop.f32.mrf.mxu1 }
 0x243   : > { %3228 = vmatmul.msk.f32.gmra.mxu0 %vm2066_vm2, %v4324_v42  ;;  %v2045_v38 = vadd.f32 %v2035_v22, %v1959_v56 }
 0x245   : > { %v2057_v50 = vadd.f32 %v4211_v39, %v2045_v38  ;;  %v2595_v39 = vld [vmem:[#allocation3 + $0xdf] sm:$0xff] }
 0x247   : > { %v2065_v34 = vmax.f32 %v2057_v50, 0.0 }
 0x248   : > { %v2122_v45 = vld [vmem:[#allocation3 + $0xb0] sm:$0xff] }
 0x249   : > { %v2113_v27 = vld [vmem:[#allocation3 + $0xaf] sm:$0xff]  ;;  %2105 = vst.msk [vmem:[#allocation3 + $0xc8] sm:$0xff] %vm2066_vm2, %v2065_v34  ;;  %3212 = vmatmul.msk.f32.gmra.mxu2 %vm2066_vm2, %v2122_v45 }
 0x24a   : > { %v2262_v2 = vld [vmem:[#allocation3 + $0xb1] sm:$0xff]  ;;  %3220 = vmatmul.msk.f32.gmra.mxu3 %vm2066_vm2, %v2113_v27  ;;  %3237 = vmatmul.msk.f32.gmra.mxu1 %vm2066_vm2, %v2113_v27 }
 0x24b   : > { %3229 = vmatmul.msk.f32.gmra.mxu0 %vm2066_vm2, %v2262_v2 }
 0x250   : > { %v2345_v48 = vld [vmem:[#allocation3 + $0xc7] sm:$0xff] }
 0x251   : > { %3240 = vmatmul.msk.f32.vlgmr.msrb.gmra.mxu2 %vm2066_vm2, %v4225_v18  ;;  %v2428_v18 = vld [vmem:[#allocation3 + $0xc8] sm:$0xff] }
 0x252   : > { %3249 = vmatmul.msk.f32.vlgmr.msra.gmra.mxu3 %vm2066_vm2, %v4227_v17  ;;  %3238 = vmatmul.msk.f32.gmra.mxu1 %vm2066_vm2, %v2345_v48  ;;  %v2511_v17 = vld [vmem:[#allocation3 + $0xc9] sm:$0xff] }
 0x253   : > { %3258 = vmatmul.msk.f32.vlgmr.msra.gmra.mxu0 %vm2066_vm2, %v4244_v59  ;;  %v2166_v59 = vpop.f32.mrf.mxu2 }
 0x254   : > { %v2232_v9 = vadd.f32 %v2231_v41, %v2166_v59 }
 0x256   : > { %v2330_v51 = vadd.f32 %v2306_v23, %v2232_v9 }
 0x259   : > { %3241 = vmatmul.msk.f32.gmra.mxu2 %vm2066_vm2, %v4242_v21 }
 0x25a   : > { %3250 = vmatmul.msk.f32.gmra.mxu3 %vm2066_vm2, %v4246_v12  ;;  %3267 = vmatmul.msk.f32.vlgmr.msra.gmra.mxu1 %vm2066_vm2, %v4242_v21  ;;  %v2678_v21 = vld [vmem:[#allocation3 + $0xe0] sm:$0xff] }
 0x25b   : > { %3259 = vmatmul.msk.f32.gmra.mxu0 %vm2066_vm2, %v4265_v11 }
 0x261   : > { %3242 = vmatmul.msk.f32.gmra.mxu2 %vm2066_vm2, %v4263_v58 }
 0x262   : > { %3251 = vmatmul.msk.f32.gmra.mxu3 %vm2066_vm2, %v4267_v40  ;;  %3268 = vmatmul.msk.f32.gmra.mxu1 %vm2066_vm2, %v4263_v58 }
 0x263   : > { %3260 = vmatmul.msk.f32.gmra.mxu0 %vm2066_vm2, %v4292_v13 }
 0x269   : > { %3243 = vmatmul.msk.f32.gmra.mxu2 %vm2066_vm2, %v4290_v43 }
 0x26a   : > { %3252 = vmatmul.msk.f32.gmra.mxu3 %vm2066_vm2, %v4294_v54  ;;  %3269 = vmatmul.msk.f32.gmra.mxu1 %vm2066_vm2, %v4290_v43 }
 0x26b   : > { %3261 = vmatmul.msk.f32.gmra.mxu0 %vm2066_vm2, %v2111_v30 }
 0x271   : > { %3244 = vmatmul.msk.f32.gmra.mxu2 %vm2066_vm2, %v2120_v25 }
 0x272   : > { %3253 = vmatmul.msk.f32.gmra.mxu3 %vm2066_vm2, %v4315_v8  ;;  %3270 = vmatmul.msk.f32.gmra.mxu1 %vm2066_vm2, %v2120_v25 }
 0x273   : > { %3262 = vmatmul.msk.f32.gmra.mxu0 %vm2066_vm2, %v2112_v1 }
 0x279   : > { %3245 = vmatmul.msk.f32.gmra.mxu2 %vm2066_vm2, %v2121_v20 }
 0x27a   : > { %3254 = vmatmul.msk.f32.gmra.mxu3 %vm2066_vm2, %v4324_v42  ;;  %3271 = vmatmul.msk.f32.gmra.mxu1 %vm2066_vm2, %v2121_v20 }
 0x27b   : > { %3263 = vmatmul.msk.f32.gmra.mxu0 %vm2066_vm2, %v2113_v27 }
 0x281   : > { %3246 = vmatmul.msk.f32.gmra.mxu2 %vm2066_vm2, %v2122_v45 }
 0x282   : > { %3255 = vmatmul.msk.f32.gmra.mxu3 %vm2066_vm2, %v2262_v2  ;;  %3272 = vmatmul.msk.f32.gmra.mxu1 %vm2066_vm2, %v2122_v45 }
 0x283   : > { %3264 = vmatmul.msk.f32.gmra.mxu0 %vm2066_vm2, %v2345_v48 }
 0x289   : > { %3247 = vmatmul.msk.f32.gmra.mxu2 %vm2066_vm2, %v2428_v18 }
 0x28a   : > { %3256 = vmatmul.msk.f32.gmra.mxu3 %vm2066_vm2, %v2511_v17  ;;  %3273 = vmatmul.msk.f32.gmra.mxu1 %vm2066_vm2, %v2428_v18 }
 0x28b   : > { %3265 = vmatmul.msk.f32.gmra.mxu0 %vm2066_vm2, %v2595_v39 }
 0x291   : > { %3276 = vmatmul.msk.f32.vlgmr.msra.gmra.mxu2 %vm2066_vm2, %v4246_v12 }
 0x292   : > { %3274 = vmatmul.msk.f32.gmra.mxu1 %vm2066_vm2, %v2678_v21 }
 0x297   : > { %v2389_v12 = vpop.f32.mrf.mxu1 }
 0x298   : > { %v2413_v33 = vadd.f32 %v2389_v12, %v2330_v51 }
 0x299   : > { %3277 = vmatmul.msk.f32.gmra.mxu2 %vm2066_vm2, %v4267_v40  ;;  %v2309_v40 = vpop.f32.mrf.mxu0 }
 0x29c   : > { %v2169_v58 = vpop.f32.mrf.mxu2 }
 0x29d   : > { %v2234_v7 = vpop.f32.mrf.mxu3 }
 0x29e   : > { %v2235_v61 = vadd.f32 %v2234_v7, %v2169_v58 }
 0x29f   : > { %v2392_v31 = vpop.f32.mrf.mxu1 }
 0x2a0   : > { %v2331_v1 = vadd.f32 %v2309_v40, %v2235_v61 }
 0x2a1   : > { %3278 = vmatmul.msk.f32.gmra.mxu2 %vm2066_vm2, %v4294_v54  ;;  %v2312_v26 = vpop.f32.mrf.mxu0 }
 0x2a2   : > { %v2414_v38 = vadd.f32 %v2392_v31, %v2331_v1 }
 0x2a4   : > { %v2172_v11 = vpop.f32.mrf.mxu2 }
 0x2a5   : > { %v2237_v6 = vpop.f32.mrf.mxu3 }
 0x2a6   : > { %v2238_v50 = vadd.f32 %v2237_v6, %v2172_v11 }
 0x2a7   : > { %v2395_v36 = vpop.f32.mrf.mxu1 }
 0x2a8   : > { %v2332_v48 = vadd.f32 %v2312_v26, %v2238_v50 }
 0x2a9   : > { %3279 = vmatmul.msk.f32.gmra.mxu2 %vm2066_vm2, %v4315_v8  ;;  %v2315_v13 = vpop.f32.mrf.mxu0 }
 0x2aa   : > { %v2415_v58 = vadd.f32 %v2395_v36, %v2332_v48 }
 0x2ac   : > { %v4395_v3 = vpop.f32.mrf.mxu2 }
 0x2ad   : > { %v2240_v63 = vpop.f32.mrf.mxu3 }
 0x2ae   : > { %v2241_v41 = vadd.f32 %v2240_v63, %v4395_v3 }
 0x2af   : > { %v2398_v54 = vpop.f32.mrf.mxu1 }
 0x2b0   : > { %v2333_v31 = vadd.f32 %v2315_v13, %v2241_v41 }
 0x2b1   : > { %3280 = vmatmul.msk.f32.gmra.mxu2 %vm2066_vm2, %v4324_v42  ;;  %v4410_v46 = vpop.f32.mrf.mxu0 }
 0x2b2   : > { %v2416_v63 = vadd.f32 %v2398_v54, %v2333_v31 }
 0x2b4   : > { %v4399_v24 = vpop.f32.mrf.mxu2 }
 0x2b5   : > { %v2243_v14 = vpop.f32.mrf.mxu3 }
 0x2b7   : > { %v4412_v44 = vpop.f32.mrf.mxu1 }
 0x2b9   : > { %3281 = vmatmul.msk.f32.gmra.mxu2 %vm2066_vm2, %v2262_v2  ;;  %v4416_v57 = vpop.f32.mrf.mxu0 }
 0x2bc   : > { %v4402_v4 = vpop.f32.mrf.mxu2 }
 0x2bd   : > { %v4414_v55 = vpop.f32.mrf.mxu3 }
 0x2bf   : > { %v4418_v15 = vpop.f32.mrf.mxu1 }
 0x2c1   : > { %3282 = vmatmul.msk.f32.gmra.mxu2 %vm2066_vm2, %v2511_v17  ;;  %v4422_v29 = vpop.f32.mrf.mxu0  ;;  %v4443_v17 = vld [vmem:[%s4508_s9] ss:$0 sm:$0xff] }
 0x2c4   : > { %v4405_v32 = vpop.f32.mrf.mxu2 }
 0x2c5   : > { %v4420_v37 = vpop.f32.mrf.mxu3 }
 0x2c7   : > { %v4424_v0 = vpop.f32.mrf.mxu1 }
 0x2c9   : > { %3283 = vmatmul.msk.f32.gmra.mxu2 %vm2066_vm2, %v2761_v19  ;;  %v4430_v25 = vpop.f32.mrf.mxu0 }
 0x2cc   : > { %v4408_v43 = vpop.f32.mrf.mxu2 }
 0x2cd   : > { %v4426_v49 = vpop.f32.mrf.mxu3 }
 0x2cf   : > { %v4432_v30 = vpop.f32.mrf.mxu1 }
 0x2d1   : > { %v2639_v60 = vpop.f32.mrf.mxu0 }
 0x2d4   : > { %v2472_v62 = vpop.f32.mrf.mxu2 }
 0x2d5   : > { %v2555_v8 = vpop.f32.mrf.mxu3  ;;  %v2496_v20 = vadd.f32 %v2472_v62, %v2413_v33  ;;  %v2244_v62 = vadd.f32 %v2243_v14, %v4399_v24  ;;  %v2247_v24 = vadd.f32 %v4414_v55, %v4402_v4  ;;  %v2250_v4 = vadd.f32 %v4420_v37, %v4405_v32 }
 0x2d6   : > { %v2253_v32 = vadd.f32 %v4426_v49, %v4408_v43 }
 0x2d7   : > { %v2722_v10 = vpop.f32.mrf.mxu1  ;;  %v2579_v56 = vadd.f32 %v2555_v8, %v2496_v20  ;;  %v2334_v51 = vadd.f32 %v4410_v46, %v2244_v62 }
 0x2d9   : > { %v2642_v42 = vpop.f32.mrf.mxu0  ;;  %v2663_v45 = vadd.f32 %v2639_v60, %v2579_v56  ;;  %v2417_v54 = vadd.f32 %v4412_v44, %v2334_v51  ;;  %v2335_v56 = vadd.f32 %v4416_v57, %v2247_v24 }
 0x2db   : > { %v2746_v39 = vadd.f32 %v2722_v10, %v2663_v45 }
 0x2dc   : > { %v2475_v28 = vpop.f32.mrf.mxu2 }
 0x2dd   : > { %v2558_v35 = vpop.f32.mrf.mxu3  ;;  %v2497_v27 = vadd.f32 %v2475_v28, %v2414_v38 }
 0x2df   : > { %v2725_v34 = vpop.f32.mrf.mxu1  ;;  %v2580_v18 = vadd.f32 %v2558_v35, %v2497_v27  ;;  %v2418_v27 = vadd.f32 %v4418_v15, %v2335_v56 }
 0x2e1   : > { %v2645_v21 = vpop.f32.mrf.mxu0  ;;  %v2664_v11 = vadd.f32 %v2642_v42, %v2580_v18 }
 0x2e3   : > { %v2747_v19 = vadd.f32 %v2725_v34, %v2664_v11 }
 0x2e4   : > { %v2478_v16 = vpop.f32.mrf.mxu2 }
 0x2e5   : > { %v2561_v2 = vpop.f32.mrf.mxu3  ;;  %v2498_v12 = vadd.f32 %v2478_v16, %v2415_v58 }
 0x2e7   : > { %v2728_v40 = vpop.f32.mrf.mxu1  ;;  %v2581_v36 = vadd.f32 %v2561_v2, %v2498_v12 }
 0x2e9   : > { %v2648_v16 = vpop.f32.mrf.mxu0  ;;  %v2665_v8 = vadd.f32 %v2645_v21, %v2581_v36 }
 0x2eb   : > { %v2748_v33 = vadd.f32 %v2728_v40, %v2665_v8 }
 0x2ec   : > { %v2481_v47 = vpop.f32.mrf.mxu2 }
 0x2ed   : > { %v2564_v26 = vpop.f32.mrf.mxu3  ;;  %v2499_v9 = vadd.f32 %v2481_v47, %v2416_v63 }
 0x2ef   : > { %v2731_v10 = vpop.f32.mrf.mxu1  ;;  %v2582_v61 = vadd.f32 %v2564_v26, %v2499_v9 }
 0x2f1   : > { %v2666_v47 = vadd.f32 %v2648_v16, %v2582_v61  ;;  %v2651_v42 = vpop.f32.mrf.mxu0 }
 0x2f3   : > { %v2749_v50 = vadd.f32 %v2731_v10, %v2666_v47 }
 0x2f4   : > { %v4428_v53 = vpop.f32.mrf.mxu2 }
 0x2f5   : > { %v2567_v35 = vpop.f32.mrf.mxu3  ;;  %v2500_v1 = vadd.f32 %v4428_v53, %v2417_v54 }
 0x2f7   : > { %v2583_v34 = vadd.f32 %v2567_v35, %v2500_v1  ;;  %v2734_v45 = vpop.f32.mrf.mxu1 }
 0x2f9   : > { %v2667_v2 = vadd.f32 %v2651_v42, %v2583_v34  ;;  %v2654_v21 = vpop.f32.mrf.mxu0 }
 0x2fc   : > { %v4434_v52 = vpop.f32.mrf.mxu2 }
 0x2fd   : > { %v2570_v53 = vpop.f32.mrf.mxu3  ;;  %v2501_v48 = vadd.f32 %v4434_v52, %v2418_v27 }
 0x2ff   : > { %v2584_v58 = vadd.f32 %v2570_v53, %v2501_v48 }
 0x301   : > { %v2668_v52 = vadd.f32 %v2654_v21, %v2584_v58 }
 0x304   : > { %v4436_v5 = vpop.f32.mrf.mxu2 }
 0x305   : > { %v2573_v12 = vpop.f32.mrf.mxu3 }
 0x30c   : > { %v4438_v22 = vpop.f32.mrf.mxu2 }
 0x314   : > { %v2805_v59 = vpop.f32.mrf.mxu2 }
 0x315   : > { %v2829_v23 = vadd.f32 %v2805_v59, %v2746_v39  ;;  %v2336_v39 = vadd.f32 %v4422_v29, %v2250_v4  ;;  %v2750_v59 = vadd.f32 %v2734_v45, %v2667_v2 }
 0x317   : > { %v2841_v7 = vadd.f32 %v4443_v17, %v2829_v23  ;;  %v2419_v41 = vadd.f32 %v4424_v0, %v2336_v39  ;;  %v2737_v23 = vpop.f32.mrf.mxu1  ;;  %v2657_v0 = vpop.f32.mrf.mxu0 }
 0x318   : > { %v2751_v31 = vadd.f32 %v2737_v23, %v2668_v52 }
 0x319   : > { %v2849_v6 = vmax.f32 %v2841_v7, 0.0  ;;  %v2502_v11 = vadd.f32 %v4436_v5, %v2419_v41  ;;  %v2337_v7 = vadd.f32 %v4430_v25, %v2253_v32  ;;  %v2576_v25 = vpop.f32.mrf.mxu3 }
 0x31b   : > { %2857 = vst.msk [vmem:[%s4452_s16] sm:$0xff] %vm2066_vm2, %v2849_v6  ;;  %v2585_v6 = vadd.f32 %v2573_v12, %v2502_v11  ;;  %v2420_v43 = vadd.f32 %v4432_v30, %v2337_v7 }
 0x31c   : > { %v2808_v3 = vpop.f32.mrf.mxu2 }
 0x31d   : > { %v2830_v28 = vadd.f32 %v2808_v3, %v2747_v19  ;;  %v2669_v19 = vadd.f32 %v2657_v0, %v2585_v6  ;;  %v2503_v36 = vadd.f32 %v4438_v22, %v2420_v43 }
 0x31f   : > { %v2842_v60 = vadd.f32 %v4443_v17, %v2830_v28  ;;  %v2740_v3 = vpop.f32.mrf.mxu1  ;;  %v2586_v28 = vadd.f32 %v2576_v25, %v2503_v36  ;;  %v2660_v16 = vpop.f32.mrf.mxu0 }
 0x320   : > { %v2752_v62 = vadd.f32 %v2740_v3, %v2669_v19 }
 0x321   : > { %v2850_v13 = vmax.f32 %v2842_v60, 0.0  ;;  %v2670_v60 = vadd.f32 %v2660_v16, %v2586_v28 }
 0x323   : > { %2858 = vst.msk [vmem:[%s4452_s16 + $0x8] sm:$0xff] %vm2066_vm2, %v2850_v13 }
 0x324   : > { %v2811_v20 = vpop.f32.mrf.mxu2 }
 0x325   : > { %v2831_v14 = vadd.f32 %v2811_v20, %v2748_v33 }
 0x327   : > { %v2843_v46 = vadd.f32 %v4443_v17, %v2831_v14  ;;  %v2743_v51 = vpop.f32.mrf.mxu1 }
 0x328   : > { %v2753_v22 = vadd.f32 %v2743_v51, %v2670_v60 }
 0x329   : > { %v2851_v38 = vmax.f32 %v2843_v46, 0.0 }
 0x32b   : > { %2859 = vst.msk [vmem:[%s4452_s16 + $0x10] sm:$0xff] %vm2066_vm2, %v2851_v38 }
 0x32c   : > { %v2814_v44 = vpop.f32.mrf.mxu2 }
 0x32d   : > { %v2832_v55 = vadd.f32 %v2814_v44, %v2749_v50 }
 0x32f   : > { %v2844_v57 = vadd.f32 %v4443_v17, %v2832_v55 }
 0x331   : > { %v2852_v18 = vmax.f32 %v2844_v57, 0.0 }
 0x333   : > { %2860 = vst.msk [vmem:[%s4452_s16 + $0x18] sm:$0xff] %vm2066_vm2, %v2852_v18 }
 0x334   : > { %v2817_v15 = vpop.f32.mrf.mxu2 }
 0x335   : > { %v2833_v37 = vadd.f32 %v2817_v15, %v2750_v59 }
 0x337   : > { %v2845_v29 = vadd.f32 %v4443_v17, %v2833_v37 }
 0x339   : > { %v2853_v40 = vmax.f32 %v2845_v29, 0.0 }
 0x33b   : > { %2861 = vst.msk [vmem:[%s4452_s16 + $0x20] sm:$0xff] %vm2066_vm2, %v2853_v40 }
 0x33c   : > { %v2820_v26 = vpop.f32.mrf.mxu2 }
 0x33d   : > { %v2834_v49 = vadd.f32 %v2820_v26, %v2751_v31 }
 0x33f   : > { %v2846_v5 = vadd.f32 %v4443_v17, %v2834_v49 }
 0x341   : > { %v2854_v63 = vmax.f32 %v2846_v5, 0.0 }
 0x343   : > { %2862 = vst.msk [vmem:[%s4452_s16 + $0x28] sm:$0xff] %vm2066_vm2, %v2854_v63 }
 0x344   : > { %v2823_v8 = vpop.f32.mrf.mxu2 }
 0x345   : > { %v2835_v9 = vadd.f32 %v2823_v8, %v2752_v62 }
 0x347   : > { %v2847_v30 = vadd.f32 %v4443_v17, %v2835_v9 }
 0x349   : > { %v2855_v13 = vmax.f32 %v2847_v30, 0.0 }
 0x34b   : > { %2863 = vst.msk [vmem:[%s4452_s16 + $0x30] sm:$0xff] %vm2066_vm2, %v2855_v13 }
 0x34c   : > { %v2826_v10 = vpop.f32.mrf.mxu2 }
 0x34d   : > { %v2836_v33 = vadd.f32 %v2826_v10, %v2753_v22 }
 0x34f   : > { %v2848_v61 = vadd.f32 %v4443_v17, %v2836_v33 }
 0x351   : > { %v2856_v35 = vmax.f32 %v2848_v61, 0.0 }
 0x353   : > { %2864 = vst.msk [vmem:[%s4452_s16 + $0x38] sm:$0xff] %vm2066_vm2, %v2856_v35 }
 0x354 PF: > { %s22_s17 = sadd.s32 1, %s3310_s17  }
 0x355   : > { %p19_p4 = scmp.ge.s32.totalorder %s22_s17, 4  }
 0x357   :  { %21 = sbr.rel (!%p19_p4) target bundleno = 1 (0x1), region = 141 }

</bundles_post_ra>
